<compile_context>
chip_gen: v7x
topology: tpu7x:2x2x1
jax: 0.10.0
libtpu: 0.0.40
codegen_flags: <defaults>
</compile_context>

<pallas_src>
import functools

import jax
import jax.numpy as jnp
from jax.experimental import pallas as pl
from jax.experimental.pallas import tpu as pltpu


def _mlp_kernel(num_layers, x_ref, *refs):
    """refs = (w0_ref, ..., w{L-1}_ref, o_ref). Fused matmul + ReLU chain."""
    w_refs = refs[:num_layers]
    o_ref = refs[num_layers]

    h = x_ref[...]                            # storage dtype (bf16) straight to MXU
    for l in range(num_layers):
        h = jnp.dot(h, w_refs[l][...], preferred_element_type=jnp.float32)
        if l != num_layers - 1:
            h = jnp.maximum(h, 0.0)                   # ReLU on the f32 accumulator
            h = h.astype(w_refs[l + 1].dtype)         # bf16 operands for next matmul
    o_ref[...] = h.astype(o_ref.dtype)


def _choose_pack(m, weights, *, itemsize=2, max_packed_weight_bytes=4 << 20):
    """Largest P in {16,8,4,2} with M % P == 0, P*dim_in lane-dense (mult of 128)
    and the largest block-diagonal weight under a VMEM/HBM guard.  1 = no pack."""
    dim_in = int(weights[0].shape[0])
    max_w_elems = max(int(w.shape[0]) * int(w.shape[1]) for w in weights)
    for p in (16, 8, 4, 2):
        if m % p:
            continue
        if (dim_in * p) % 128:
            continue
        if max_w_elems * p * p * itemsize > max_packed_weight_bytes:
            continue
        return p
    return 1


def _choose_block_rows(rows, bytes_per_row, *, target_steps=4,
                       max_block_bytes=6 << 20):
    """Row block so the grid has >= target_steps steps (both v7x TCs busy) while
    each step stays within an explicit VMEM budget.  Multiple of 16 (bf16 tile)."""
    if rows <= 16:
        return rows
    by_steps = pl.cdiv(rows, target_steps)
    by_vmem = max(16, int(max_block_bytes) // max(int(bytes_per_row), 1))
    br = max(16, min(by_steps, by_vmem))
    return ((br + 15) // 16) * 16


def mlp_pallas(x, weights, *, block_rows=None, compute_dtype=jnp.bfloat16,
               target_steps=4):
    """Fused MLP forward. x: (M, dim_in); weights[l]: (in_l, out_l) (= W_l.T)."""
    num_layers = len(weights)
    M, dim_in = x.shape
    dim_out = int(weights[-1].shape[1])
    itemsize = jnp.dtype(compute_dtype).itemsize

    xc = x.astype(compute_dtype)
    ws = [w.astype(compute_dtype) for w in weights]

    # ---- lane-dense packing (free reshapes + block-diagonal weights) --------
    pack = _choose_pack(M, weights, itemsize=itemsize)
    if pack > 1:
        xp = xc.reshape(M // pack, pack * dim_in)          # contiguous -> free
        eye = jnp.eye(pack, dtype=compute_dtype)
        wp = [jnp.kron(eye, w) for w in ws]                # block-diag copies of W
    else:
        xp, wp = xc, ws

    rows, in_w = xp.shape
    out_w = int(wp[-1].shape[1])
    widths = [in_w] + [int(w.shape[1]) for w in wp]

    if block_rows is None:
        # Per-row VMEM bytes: double-buffered in/out tiles + f32 intermediates
        # (conservative; lane padding is already gone on the packed path).
        bytes_per_row = (2 * in_w * itemsize + 2 * out_w * itemsize
                         + 4 * 4 * max(widths))
        block_rows = _choose_block_rows(rows, bytes_per_row,
                                        target_steps=target_steps)
    num_blocks = pl.cdiv(rows, block_rows)   # ragged last block handled by Pallas

    in_specs = [pl.BlockSpec((block_rows, in_w), lambda i: (i, 0))]
    for w in wp:
        # Loop-invariant blocks (constant index): fetched once, stay VMEM-resident.
        in_specs.append(pl.BlockSpec(w.shape, lambda i: (0, 0)))
    out_spec = pl.BlockSpec((block_rows, out_w), lambda i: (i, 0))

    out = pl.pallas_call(
        functools.partial(_mlp_kernel, num_layers),
        out_shape=jax.ShapeDtypeStruct((rows, out_w), compute_dtype),
        grid_spec=pltpu.PrefetchScalarGridSpec(
            num_scalar_prefetch=0,
            grid=(num_blocks,),
            in_specs=in_specs,
            out_specs=out_spec,
        ),
        compiler_params=pltpu.CompilerParams(
            dimension_semantics=("parallel",),     # shard row blocks over v7x's 2 TCs
            vmem_limit_bytes=32 * 1024 * 1024,     # explicit budget, safe on all gens
        ),
    )(xp, *wp)

    if pack > 1:
        out = out.reshape(M, dim_out)              # contiguous -> free
    return out


def mlp_reference(x, weights, compute_dtype=jnp.bfloat16):
    """Pure-JAX reference mimicking the kernel's dtype strategy (bf16 operands,
    f32 accumulation, ReLU on f32)."""
    h = x.astype(compute_dtype)
    for l, w in enumerate(weights):
        h = jnp.dot(h, w.astype(compute_dtype),
                    preferred_element_type=jnp.float32)
        if l != len(weights) - 1:
            h = jnp.maximum(h, 0.0).astype(compute_dtype)
    return h.astype(compute_dtype)


def _check(name, x, weights):
    out = jax.block_until_ready(mlp_pallas(x, weights))
    ref = mlp_reference(x, weights)
    assert out.shape == ref.shape == (x.shape[0], weights[-1].shape[1]), name
    ok = jnp.allclose(out.astype(jnp.float32), ref.astype(jnp.float32),
                      atol=2e-2, rtol=2e-2)
    assert ok, f"{name}: mismatch vs reference"


if __name__ == "__main__":
    # Shapes consistent with MLP(dim_in, dim_out, dim_hidden, num_layers).
    dim_in, dim_out, dim_hidden, num_layers = 16, 8, 32, 3

    key = jax.random.PRNGKey(0)
    keys = jax.random.split(key, 3 + num_layers)

    # Deterministic weight init (PyTorch Linear weight is (out, in); store W.T).
    weights = []
    for l in range(num_layers):
        d_i = dim_in if l == 0 else dim_hidden
        d_o = dim_out if l == num_layers - 1 else dim_hidden
        bound = 1.0 / (d_i ** 0.5)
        weights.append(jax.random.uniform(keys[3 + l], (d_i, d_o),
                                          dtype=jnp.float32,
                                          minval=-bound, maxval=bound))

    x_main = jax.random.normal(keys[0], (4096, dim_in), dtype=jnp.float32)  # pack=16
    x_ragged = jax.random.normal(keys[1], (1000, dim_in), dtype=jnp.float32)  # pack=8
    x_odd = jax.random.normal(keys[2], (37, dim_in), dtype=jnp.float32)  # pack=1 fallback

    _check("aligned (pack=16, lane-dense in+out)", x_main, weights)
    _check("ragged  (pack=8, lane-dense input)", x_ragged, weights)
    _check("odd     (pack=1 fallback, ragged grid)", x_odd, weights)

    print("KERNEL_OK")
</pallas_src>

<mosaic_0001>
module attributes {stable_mosaic.version = 11 : i64} {
  func.func @_mlp_kernel(%arg0: i32, %arg1: memref<64x256xbf16, #tpu.memory_space<vmem>>, %arg2: memref<256x512xbf16, #tpu.memory_space<vmem>>, %arg3: memref<512x512xbf16, #tpu.memory_space<vmem>>, %arg4: memref<512x128xbf16, #tpu.memory_space<vmem>>, %arg5: memref<64x128xbf16, #tpu.memory_space<vmem>>) attributes {dimension_semantics = [#tpu.dimension_semantics<parallel>], iteration_bounds = array<i64: 4>, scalar_prefetch = 0 : i64, scratch_operands = 0 : i64, tpu.core_type = #tpu.core_type<tc>, window_params = [{transform_indices = @transform_0, window_bounds = array<i64: 64, 256>}, {pipeline_mode = #tpu.pipeline_mode<synchronous>, transform_indices = @transform_1, window_bounds = array<i64: 256, 512>}, {pipeline_mode = #tpu.pipeline_mode<synchronous>, transform_indices = @transform_2, window_bounds = array<i64: 512, 512>}, {pipeline_mode = #tpu.pipeline_mode<synchronous>, transform_indices = @transform_3, window_bounds = array<i64: 512, 128>}, {transform_indices = @transform_4, window_bounds = array<i64: 64, 128>}]} {
    %c0 = arith.constant 0 : index
    %c0_0 = arith.constant 0 : index
    %0 = vector.load %arg1[%c0, %c0_0] : memref<64x256xbf16, #tpu.memory_space<vmem>>, vector<64x256xbf16>
    %c0_1 = arith.constant 0 : index
    %c0_2 = arith.constant 0 : index
    %1 = vector.load %arg2[%c0_1, %c0_2] : memref<256x512xbf16, #tpu.memory_space<vmem>>, vector<256x512xbf16>
    %cst = arith.constant dense<0.000000e+00> : vector<64x512xf32>
    %2 = tpu.matmul %0, %1, %cst {dimension_numbers = #tpu.dot_dimension_numbers<[1], [0], [0], [1], [0, 0, 1, 1], [], []>} : vector<64x256xbf16>, vector<256x512xbf16>, vector<64x512xf32> -> vector<64x512xf32>
    %cst_3 = arith.constant 0.000000e+00 : f32
    %3 = vector.broadcast %cst_3 : f32 to vector<64x512xf32>
    %4 = arith.maximumf %2, %3 : vector<64x512xf32>
    %5 = arith.truncf %4 : vector<64x512xf32> to vector<64x512xbf16>
    %c0_4 = arith.constant 0 : index
    %c0_5 = arith.constant 0 : index
    %6 = vector.load %arg3[%c0_4, %c0_5] : memref<512x512xbf16, #tpu.memory_space<vmem>>, vector<512x512xbf16>
    %cst_6 = arith.constant dense<0.000000e+00> : vector<64x512xf32>
    %7 = tpu.matmul %5, %6, %cst_6 {dimension_numbers = #tpu.dot_dimension_numbers<[1], [0], [0], [1], [0, 0, 1, 1], [], []>} : vector<64x512xbf16>, vector<512x512xbf16>, vector<64x512xf32> -> vector<64x512xf32>
    %cst_7 = arith.constant 0.000000e+00 : f32
    %8 = vector.broadcast %cst_7 : f32 to vector<64x512xf32>
    %9 = arith.maximumf %7, %8 : vector<64x512xf32>
    %10 = arith.truncf %9 : vector<64x512xf32> to vector<64x512xbf16>
    %c0_8 = arith.constant 0 : index
    %c0_9 = arith.constant 0 : index
    %11 = vector.load %arg4[%c0_8, %c0_9] : memref<512x128xbf16, #tpu.memory_space<vmem>>, vector<512x128xbf16>
    %cst_10 = arith.constant dense<0.000000e+00> : vector<64x128xf32>
    %12 = tpu.matmul %10, %11, %cst_10 {dimension_numbers = #tpu.dot_dimension_numbers<[1], [0], [0], [1], [0, 0, 1, 1], [], []>} : vector<64x512xbf16>, vector<512x128xbf16>, vector<64x128xf32> -> vector<64x128xf32>
    %13 = arith.truncf %12 : vector<64x128xf32> to vector<64x128xbf16>
    %c0_11 = arith.constant 0 : index
    %c0_12 = arith.constant 0 : index
    %14 = vector.load %arg5[%c0_11, %c0_12] : memref<64x128xbf16, #tpu.memory_space<vmem>>, vector<64x128xbf16>
    tpu.vector_store %arg5[%c0_11, %c0_12], %13 {strides = array<i32>} : memref<64x128xbf16, #tpu.memory_space<vmem>>, vector<64x128xbf16>,
    return
  }
  func.func @transform_0(%arg0: i32) -> (i32, i32) {
    %c0_i32 = arith.constant 0 : i32
    %c0_i32_0 = arith.constant 0 : i32
    return %arg0, %c0_i32 : i32, i32
  }
  func.func @transform_1(%arg0: i32) -> (i32, i32) {
    %c0_i32 = arith.constant 0 : i32
    %c0_i32_0 = arith.constant 0 : i32
    %c0_i32_1 = arith.constant 0 : i32
    return %c0_i32, %c0_i32_0 : i32, i32
  }
  func.func @transform_2(%arg0: i32) -> (i32, i32) {
    %c0_i32 = arith.constant 0 : i32
    %c0_i32_0 = arith.constant 0 : i32
    %c0_i32_1 = arith.constant 0 : i32
    return %c0_i32, %c0_i32_0 : i32, i32
  }
  func.func @transform_3(%arg0: i32) -> (i32, i32) {
    %c0_i32 = arith.constant 0 : i32
    %c0_i32_0 = arith.constant 0 : i32
    %c0_i32_1 = arith.constant 0 : i32
    return %c0_i32, %c0_i32_0 : i32, i32
  }
  func.func @transform_4(%arg0: i32) -> (i32, i32) {
    %c0_i32 = arith.constant 0 : i32
    %c0_i32_0 = arith.constant 0 : i32
    return %arg0, %c0_i32 : i32, i32
  }
}

</mosaic_0001>

<bundles_post_ra>
// kernel: tpu_custom_call.1
= control target key start
LH: loop header
LB: loop body
LE: loop exit
PB: predicated region body
PF: predicated region fallthrough
CT: control target
= control target key end

     0   :  { %9 = vsyncpa [#allocation3], 0  ;;  %s3911_s0 = inlined_call_operand.hbm [shape: bf16[256,256], index: 0, kind: input, shape index: {}]   ;;  %s3912_s1 = inlined_call_operand.hbm [shape: bf16[256,512], index: 1, kind: input, shape index: {}]   ;;  %s3913_s2 = inlined_call_operand.hbm [shape: bf16[512,512], index: 2, kind: input, shape index: {}]   ;;  %s3914_s3 = inlined_call_operand.hbm [shape: bf16[512,128], index: 3, kind: input, shape index: {}]   ;;  %s3915_s4 = inlined_call_operand.hbm [shape: bf16[256,128], index: 4, kind: output, shape index: {}]  }
   0x1   :  { %11 = vsyncpa [#allocation3 + $0x1], 0 }
   0x2   :  { %12 = vsyncpa [#allocation6], 0 }
   0x3   :  { %13 = vsyncpa [#allocation9], 0 }
   0x4   :  { %14 = vsyncpa [#allocation4], 0 }
   0x5   :  { %16 = vsyncpa [#allocation4 + $0x1], 0  ;;  %s3592_s15 = smov 0   ;;  %s3594_s16 = smov 0  }
   0x6   :  { %s3596_s17 = smov 0   ;;  %s3598_s18 = smov 0  }
   0x7 LB: > { %s3613_s19 = sadd.s32 4294967295, %s3552_s18   ;;  %s2540_s20 = sadd.s32 4294967294, %s3552_s18   ;;  %s3552_s18 = sphi %s3598_s18, %s3937_s18   ;;  %s3548_s17 = sphi %s3596_s17, %s3936_s17   ;;  %s3544_s16 = sphi %s3594_s16, %s3935_s16   ;;  %s3540_s15 = sphi %s3592_s15, %s3934_s15  }
   0x8   : > { %p42_p0 = scmp.ne.s32.totalorder %s3544_s16, %s3540_s15  ;;  %p3916_p1 = scmp.eq.s32.totalorder %s3613_s19, 0 }
   0x9   : > { %p135_p3 = scmp.eq.s32.totalorder %s2540_s20, 3  ;;  %p2541_p5 = scmp.ge.s32.totalorder %s3552_s18, 1 }
   0xa   : > { %p3622_p4 = por %p3916_p1, %p42_p0  ;;  %p142_p7 = scmp.lt.s32.totalorder %s3552_s18, 5 }
   0xb   : > { %p3627_p6 = por %p135_p3, %p42_p0  ;;  %s3554_s24 = smov [#allocation5]  }
   0xc   : > { %s3919_s21 = scalar_select %p3622_p4, 1, 0 }
   0xd   : > { %s3920_s22 = scalar_select %p3627_p6, 1, 0 }
   0xe   : > { %p3632_p8 = pnand %p2541_p5, %p142_p7  ;;  %s154_s25 = sshll.u32 %s3554_s24, 4  ;;  %s3636_s25 = int_to_ptr.vmem [resolvable:$true] %s154_s25 }
   0xf   : > { %s3555_s27 = smov [#allocation7]   ;;  %s3556_s29 = smov [#allocation8]  }
  0x10   : > { %s3921_s23 = scalar_select %p3632_p8, 1, 0 }
  0x11   : > { %p2963_p9 = pneg %p3632_p8  ;;  %s167_s28 = sshll.u32 %s3555_s27, 4  ;;  %s3646_s28 = int_to_ptr.vmem [resolvable:$true] %s167_s28 }
  0x12   : > { %s3648_s30 = sshll.u32 %s3556_s29, 4  ;;  %s3364_s7 = scalar_lea.hbm %s3912_s1, 8192  ;;  %s181_s30 = int_to_ptr.vmem [resolvable:$true] %s3648_s30 }
  0x13   : > { %p3642_p10 = pnand %p2963_p9, %p3916_p1  ;;  %p3365_p11 = scmp.ne.s32.totalorder %s3912_s1, %s3364_s7 }
  0x14   : > { %p3371_p3 = scmp.lt.u32.totalorder %s3364_s7, %s3912_s1 }
  0x15   : > { %p3658_p12 = pneg %p3642_p10 }
  0x17   : > { %p3367_p13 = pnand %p3658_p12, %p3365_p11 }
  0x19   : > { %p3368_p0 = pneg %p3367_p13 }
  0x1b   : > { %p3373_p5 = pnand %p3371_p3, %p3368_p0 }
  0x1d   : > { %3376 = shalt.err (!%p3373_p5)
}
  0x1e   : > { %s3377_s13 = scalar_lea.vmem %s3636_s25, 8192  ;;  %p3385_p2 = scmp.lt.s32.totalorder %s3636_s25, %s3636_s25 }
  0x1f   : > { %p3378_p7 = scmp.ne.s32.totalorder %s3636_s25, %s3377_s13  ;;  %p3386_p6 = scmp.lt.s32.totalorder %s3377_s13, %s3377_s13 }
  0x21   : > { %p3380_p9 = pnand %p3378_p7, %p3658_p12  ;;  %p3387_p11 = por %p3386_p6, %p3385_p2 }
  0x23   : > { %p3381_p1 = pneg %p3380_p9 }
  0x25   : > { %p3388_p13 = pnand %p3387_p11, %p3381_p1 }
  0x27   : > { %3391 = shalt.err (!%p3388_p13)
}
  0x28   : > { %s3557_s14 = smov 256   ;;  %s3558_s20 = smov 16  }
  0x29   : > { %2966 = dma.hbm_to_vmem [thread:$0]  (!%p3642_p10), %s3912_s1, 8192, %s3636_s25, [#allocation6], %s3557_s14, %s3557_s14, %s3558_s20  }
  0x2a   : > { %s3392_s6 = scalar_lea.hbm %s3913_s2, 16384 }
  0x2b   : > { %p3393_p2 = scmp.ne.s32.totalorder %s3913_s2, %s3392_s6  ;;  %p3399_p0 = scmp.lt.u32.totalorder %s3392_s6, %s3913_s2 }
  0x2d   : > { %p3395_p1 = pnand %p3393_p2, %p3658_p12 }
  0x2f   : > { %p3396_p6 = pneg %p3395_p1 }
  0x31   : > { %p3401_p3 = pnand %p3399_p0, %p3396_p6 }
  0x33   : > { %3404 = shalt.err (!%p3401_p3)
}
  0x34   : > { %s3405_s25 = scalar_lea.vmem %s3646_s28, 16384  ;;  %p3413_p11 = scmp.lt.s32.totalorder %s3646_s28, %s3646_s28 }
  0x35   : > { %p3406_p5 = scmp.ne.s32.totalorder %s3646_s28, %s3405_s25  ;;  %p3414_p13 = scmp.lt.s32.totalorder %s3405_s25, %s3405_s25 }
  0x37   : > { %p3408_p7 = pnand %p3406_p5, %p3658_p12  ;;  %p3415_p2 = por %p3414_p13, %p3413_p11 }
  0x39   : > { %p3409_p9 = pneg %p3408_p7 }
  0x3b   : > { %p3416_p1 = pnand %p3415_p2, %p3409_p9 }
  0x3d   : > { %3419 = shalt.err (!%p3416_p1)
}
  0x3e   : > { %2969 = dma.hbm_to_vmem [thread:$0]  (!%p3642_p10), %s3913_s2, 16384, %s3646_s28, [#allocation6], %s3557_s14, %s3557_s14, %s3558_s20  }
  0x3f   : > { %s3420_s29 = scalar_lea.hbm %s3914_s3, 4096 }
  0x40   : > { %p3421_p6 = scmp.ne.s32.totalorder %s3914_s3, %s3420_s29  ;;  %p3427_p5 = scmp.lt.u32.totalorder %s3420_s29, %s3914_s3 }
  0x42   : > { %p3423_p0 = pnand %p3421_p6, %p3658_p12 }
  0x44   : > { %p3424_p3 = pneg %p3423_p0 }
  0x46   : > { %p3429_p7 = pnand %p3427_p5, %p3424_p3 }
  0x48   : > { %3432 = shalt.err (!%p3429_p7)
}
  0x49   : > { %s3433_s9 = scalar_lea.vmem %s181_s30, 4096  ;;  %p3441_p2 = scmp.lt.s32.totalorder %s181_s30, %s181_s30 }
  0x4a   : > { %p3434_p9 = scmp.ne.s32.totalorder %s181_s30, %s3433_s9  ;;  %p3442_p1 = scmp.lt.s32.totalorder %s3433_s9, %s3433_s9 }
  0x4c   : > { %p3436_p11 = pnand %p3434_p9, %p3658_p12  ;;  %p3443_p4 = por %p3442_p1, %p3441_p2 }
  0x4e   : > { %p3437_p13 = pneg %p3436_p11 }
  0x50   : > { %p3444_p8 = pnand %p3443_p4, %p3437_p13 }
  0x52   : > { %3447 = shalt.err (!%p3444_p8)
}
  0x53   : > { %s3559_s28 = smov 64   ;;  %s3560_s10 = smov 4  }
  0x54   : > { %2972 = dma.hbm_to_vmem [thread:$0]  (!%p3642_p10), %s3914_s3, 4096, %s181_s30, [#allocation9], %s3559_s28, %s3559_s28, %s3560_s10  }
  0x55   : > { %s3722_s11 = sadd.s32 1, %s3552_s18   ;;  %s29_s12 = sadd.s32 1, %s3548_s17 }
  0x56   : > { %s26_s25 = ssub.s32 %s3552_s18, %s3722_s11  ;;  %p36_p8 = scmp.ne.s32.totalorder %s3548_s17, %s3544_s16 }
  0x57   : > { %p27_p4 = scmp.eq.s32.totalorder %s26_s25, 0  ;;  %p37_p12 = scmp.eq.s32.totalorder %s3552_s18, 0 }
  0x58   : > { %p2984_p6 = scmp.lt.s32.totalorder %s3552_s18, 4  ;;  %p3924_p3 = scmp.eq.s32.totalorder %s3613_s19, 3 }
  0x59   : > { %s3732_s13 = scalar_select %p27_p4, %s3548_s17, %s29_s12  }
  0x5a   : > { %p38_p0 = por %p37_p12, %p36_p8  ;;  %p3736_p5 = por %p3924_p3, %p36_p8 }
  0x5b   : > { %s194_s26 = sand.u32 1, %s3548_s17   ;;  %s2802_s27 = sshll.u32 %s3552_s18, 10 }
  0x5c   : > { %s2546_s30 = sshll.u32 %s194_s26, 6  ;;  %s3745_s6 = scalar_lea.hbm %s3911_s0, %s2802_s27 }
  0x5d   : > { %s198_s7 = scalar_lea.vmem [#allocation2], %s2546_s30  ;;  %p3747_p10 = pnand %p2984_p6, %p38_p0 }
  0x5e   : > { %s206_s8 = sshll.u32 %s198_s7, 4  ;;  %s3753_s28 = scalar_lea.sflag [#allocation3], %s194_s26  ;;  %s3751_s8 = int_to_ptr.vmem [resolvable:$true] %s206_s8 }
  0x5f   : > { %s3448_s10 = scalar_lea.hbm %s3745_s6, 1024  ;;  %p3450_p9 = pneg %p3747_p10 }
  0x60   : > { %p3449_p7 = scmp.ne.s32.totalorder %s3745_s6, %s3448_s10  ;;  %s3453_s25 = scalar_lea.hbm %s3911_s0, 4096 }
  0x61   : > { %p3454_p2 = scmp.lt.u32.totalorder %s3745_s6, %s3911_s0  ;;  %p3455_p1 = scmp.lt.u32.totalorder %s3453_s25, %s3448_s10 }
  0x62   : > { %p3451_p11 = pnand %p3450_p9, %p3449_p7  ;;  %p3457_p8 = scmp.lt.u32.totalorder %s3448_s10, %s3745_s6 }
  0x63   : > { %p3456_p4 = por %p3455_p1, %p3454_p2 }
  0x64   : > { %p3452_p13 = pneg %p3451_p11 }
  0x65   : > { %p3458_p12 = por %p3457_p8, %p3456_p4 }
  0x67   : > { %p3459_p6 = pnand %p3458_p12, %p3452_p13 }
  0x69   : > { %3462 = shalt.err (!%p3459_p6)
}
  0x6a   : > { %s3463_s26 = scalar_lea.vmem %s3751_s8, 1024  ;;  %s3561_s30 = smov [#allocation2]  }
  0x6b   : > { %p3464_p0 = scmp.ne.s32.totalorder %s3751_s8, %s3463_s26  ;;  %s3468_s29 = sshll.u32 %s3561_s30, 4  ;;  %s3469_s29 = int_to_ptr.vmem [resolvable:$false] %s3468_s29 }
  0x6c   : > { %s3470_s5 = scalar_lea.vmem %s3469_s29, 2048  ;;  %p3471_p11 = scmp.lt.s32.totalorder %s3751_s8, %s3469_s29 }
  0x6d   : > { %p3466_p3 = pnand %p3464_p0, %p3450_p9  ;;  %p3472_p2 = scmp.lt.s32.totalorder %s3470_s5, %s3463_s26 }
  0x6f   : > { %p3467_p7 = pneg %p3466_p3  ;;  %p3473_p1 = por %p3472_p2, %p3471_p11 }
  0x71   : > { %p3474_p4 = pnand %p3473_p1, %p3467_p7 }
  0x73   : > { %3477 = shalt.err (!%p3474_p4)
}
  0x74   : > { %s3562_s7 = smov 128   ;;  %s3563_s10 = smov 8  }
  0x75   : > { %2976 = dma.hbm_to_vmem [thread:$0]  (!%p3747_p10), %s3745_s6, 1024, %s3751_s8, %s3753_s28, %s3562_s7, %s3562_s7, %s3563_s10  }
  0x76   : > { %p3927_p9 = scmp.ne.s32.totalorder %s3921_s23, 0 }
  0x77   : > { %s3784_s14 = sand.u32 (!%p3927_p9), 1, %s3544_s16   ;;  %p3928_p13 = scmp.ne.s32.totalorder (!%p3927_p9), %s3919_s21, 0 }
  0x78   : > { %218 = sbr.rel (%p3927_p9) target bundleno = 964 (0x3c4), region = 36  ;;  %s2551_s20 = sshll.u32 (!%p3927_p9), %s3784_s14, 6 }
  0x79   : > { %s221_s25 = scalar_lea.sflag (!%p3927_p9), [#allocation3], %s3784_s14  ;;  %s3788_s12 = scalar_lea.vmem (!%p3927_p9), [#allocation2], %s2551_s20 }
  0x7f   : > { %3523 = dma.done.wait (%p3928_p13), %s221_s25, 1024  }
  0x80   : > { %3525 = vsyncadd (%p3928_p13), %s221_s25, 4294966272  ;;  %p3929_p10 = scmp.eq.s32.totalorder %s3613_s19, 0 }
  0x82   : > { %3527 = dma.done.wait (%p3929_p10), [#allocation6], 24576   ;;  %p3930_p8 = pmov %p3929_p10 }
  0x84   : > { %3529 = vsyncadd (%p3930_p8), [#allocation6], 4294942720  ;;  %p3931_p12 = pmov %p3930_p8 }
  0x85   : > { %p3932_p6 = pmov %p3930_p8 }
  0x86   : > { %3531 = dma.done.wait (%p3931_p12), [#allocation9], 4096  }
  0x87   : > { %3533 = vsyncadd (%p3932_p6), [#allocation9], 4294963200  ;;  %v3032_v0 = vld [vmem:[#allocation5 + $0x4] ss:$16 sps:$4 sm:$0xff]   ;;  %v3034_v1 = vld [vmem:[#allocation5] ss:$16 sps:$4 sm:$0xff]  }
  0x88   : > { %696 = vmatprep.subr.bf16.mxu0 %v3032_v0  ;;  %v3035_v2 = vld [vmem:[#allocation5 + $0x24] ss:$16 sps:$4 sm:$0xff]   ;;  %v3037_v3 = vld [vmem:[#allocation5 + $0x20] ss:$16 sps:$4 sm:$0xff]   ;;  %v3079_v13 = vld [vmem:[#allocation5 + $0xc] ss:$16 sps:$4 sm:$0xff]  }
  0x89   : > { %697 = vmatpush1.bf16.msra.mxu0 %v3034_v1  ;;  %v3038_v4 = vld [vmem:[#allocation5 + $0x44] ss:$16 sps:$4 sm:$0xff]   ;;  %v3040_v5 = vld [vmem:[#allocation5 + $0x40] ss:$16 sps:$4 sm:$0xff]   ;;  %v3082_v15 = vld [vmem:[#allocation5 + $0x8] ss:$16 sps:$4 sm:$0xff]   ;;  %769 = vmatprep.subr.bf16.mxu1 %v3079_v13 }
  0x8a   : > { %698 = vmatprep.subr.bf16.mxu0 %v3035_v2  ;;  %v3041_v6 = vld [vmem:[#allocation5 + $0x64] ss:$16 sps:$4 sm:$0xff]   ;;  %v3043_v7 = vld [vmem:[#allocation5 + $0x60] ss:$16 sps:$4 sm:$0xff]   ;;  %770 = vmatpush1.bf16.msra.mxu1 %v3082_v15  ;;  %v3086_v18 = vld [vmem:[#allocation5 + $0x2c] ss:$16 sps:$4 sm:$0xff]  }
  0x8b   : > { %v3044_v8 = vld [vmem:[#allocation5 + $0x84] ss:$16 sps:$4 sm:$0xff]   ;;  %v3046_v9 = vld [vmem:[#allocation5 + $0x80] ss:$16 sps:$4 sm:$0xff]   ;;  %v3088_v19 = vld [vmem:[#allocation5 + $0x28] ss:$16 sps:$4 sm:$0xff]   ;;  %771 = vmatprep.subr.bf16.mxu1 %v3086_v18 }
  0x8c   : > { %v3047_v10 = vld [vmem:[#allocation5 + $0xa4] ss:$16 sps:$4 sm:$0xff]   ;;  %v3049_v11 = vld [vmem:[#allocation5 + $0xa0] ss:$16 sps:$4 sm:$0xff]   ;;  %v3089_v20 = vld [vmem:[#allocation5 + $0x4c] ss:$16 sps:$4 sm:$0xff]  }
  0x8d   : > { %699 = vmatpush1.bf16.msra.mxu0 %v3037_v3  ;;  %v3050_v12 = vld [vmem:[#allocation5 + $0xc4] ss:$16 sps:$4 sm:$0xff]   ;;  %v3052_v14 = vld [vmem:[#allocation5 + $0xc0] ss:$16 sps:$4 sm:$0xff]   ;;  %v3091_v23 = vld [vmem:[#allocation5 + $0x48] ss:$16 sps:$4 sm:$0xff]  }
  0x8e   : > { %700 = vmatprep.subr.bf16.mxu0 %v3038_v4  ;;  %v3053_v16 = vld [vmem:[#allocation5 + $0xe4] ss:$16 sps:$4 sm:$0xff]   ;;  %v3055_v21 = vld [vmem:[#allocation5 + $0xe0] ss:$16 sps:$4 sm:$0xff]   ;;  %772 = vmatpush1.bf16.msra.mxu1 %v3088_v19  ;;  %v3092_v24 = vld [vmem:[#allocation5 + $0x6c] ss:$16 sps:$4 sm:$0xff]  }
  0x8f   : > { %v3085_v17 = vld [vmem:[%s3788_s12 + $0x4] ss:$8 sps:$4 sm:$0xff]   ;;  %773 = vmatprep.subr.bf16.mxu1 %v3089_v20  ;;  %v3058_v25 = vld [vmem:[#allocation5 + $0x100] ss:$16 sps:$4 sm:$0xff]   ;;  %v3094_v27 = vld [vmem:[#allocation5 + $0x68] ss:$16 sps:$4 sm:$0xff]  }
  0x90   : > { %728 = vmatprep.mubr.bf16.mxu0 %v3085_v17  ;;  %801 = vmatprep.mubr.bf16.mxu1 %v3085_v17  ;;  %v3056_v22 = vld [vmem:[#allocation5 + $0x104] ss:$16 sps:$4 sm:$0xff]   ;;  %v3095_v28 = vld [vmem:[#allocation5 + $0x8c] ss:$16 sps:$4 sm:$0xff]   ;;  %v3061_v29 = vld [vmem:[#allocation5 + $0x120] ss:$16 sps:$4 sm:$0xff]  }
  0x91   : > { %701 = vmatpush1.bf16.msra.mxu0 %v3040_v5  ;;  %v3059_v26 = vld [vmem:[#allocation5 + $0x124] ss:$16 sps:$4 sm:$0xff]   ;;  %v3097_v31 = vld [vmem:[#allocation5 + $0x88] ss:$16 sps:$4 sm:$0xff]   ;;  %v3098_v32 = vld [vmem:[#allocation5 + $0xac] ss:$16 sps:$4 sm:$0xff]  }
  0x92   : > { %702 = vmatprep.subr.bf16.mxu0 %v3041_v6  ;;  %774 = vmatpush1.bf16.msra.mxu1 %v3091_v23  ;;  %v3062_v30 = vld [vmem:[#allocation5 + $0x144] ss:$16 sps:$4 sm:$0xff]   ;;  %v3064_v33 = vld [vmem:[#allocation5 + $0x140] ss:$16 sps:$4 sm:$0xff]   ;;  %v3100_v35 = vld [vmem:[#allocation5 + $0xa8] ss:$16 sps:$4 sm:$0xff]  }
  0x93   : > { %775 = vmatprep.subr.bf16.mxu1 %v3092_v24  ;;  %v3065_v34 = vld [vmem:[#allocation5 + $0x164] ss:$16 sps:$4 sm:$0xff]   ;;  %v3101_v36 = vld [vmem:[#allocation5 + $0xcc] ss:$16 sps:$4 sm:$0xff]   ;;  %v3067_v37 = vld [vmem:[#allocation5 + $0x160] ss:$16 sps:$4 sm:$0xff]  }
  0x94   : > { %v3068_v38 = vld [vmem:[#allocation5 + $0x184] ss:$16 sps:$4 sm:$0xff]   ;;  %v3103_v39 = vld [vmem:[#allocation5 + $0xc8] ss:$16 sps:$4 sm:$0xff]   ;;  %v3104_v40 = vld [vmem:[#allocation5 + $0xec] ss:$16 sps:$4 sm:$0xff]  }
  0x95   : > { %703 = vmatpush1.bf16.msra.mxu0 %v3043_v7  ;;  %v3070_v41 = vld [vmem:[#allocation5 + $0x180] ss:$16 sps:$4 sm:$0xff]   ;;  %v3071_v42 = vld [vmem:[#allocation5 + $0x1a4] ss:$16 sps:$4 sm:$0xff]   ;;  %v3106_v43 = vld [vmem:[#allocation5 + $0xe8] ss:$16 sps:$4 sm:$0xff]  }
  0x96   : > { %704 = vmatprep.subr.bf16.mxu0 %v3044_v8  ;;  %776 = vmatpush1.bf16.msra.mxu1 %v3094_v27  ;;  %v3107_v44 = vld [vmem:[#allocation5 + $0x10c] ss:$16 sps:$4 sm:$0xff]   ;;  %v3073_v45 = vld [vmem:[#allocation5 + $0x1a0] ss:$16 sps:$4 sm:$0xff]   ;;  %v3074_v46 = vld [vmem:[#allocation5 + $0x1c4] ss:$16 sps:$4 sm:$0xff]  }
  0x97   : > { %777 = vmatprep.subr.bf16.mxu1 %v3095_v28  ;;  %v3109_v47 = vld [vmem:[#allocation5 + $0x108] ss:$16 sps:$4 sm:$0xff]   ;;  %v3110_v48 = vld [vmem:[#allocation5 + $0x12c] ss:$16 sps:$4 sm:$0xff]   ;;  %v3076_v49 = vld [vmem:[#allocation5 + $0x1c0] ss:$16 sps:$4 sm:$0xff]  }
  0x98   : > { %v3077_v50 = vld [vmem:[#allocation5 + $0x1e4] ss:$16 sps:$4 sm:$0xff]   ;;  %v3112_v51 = vld [vmem:[#allocation5 + $0x128] ss:$16 sps:$4 sm:$0xff]   ;;  %v3116_v52 = vld [vmem:[#allocation5 + $0x14c] ss:$16 sps:$4 sm:$0xff]  }
  0x99   : > { %705 = vmatpush1.bf16.msra.mxu0 %v3046_v9  ;;  %v3081_v53 = vld [vmem:[#allocation5 + $0x1e0] ss:$16 sps:$4 sm:$0xff]   ;;  %v3118_v54 = vld [vmem:[#allocation5 + $0x148] ss:$16 sps:$4 sm:$0xff]   ;;  %v3142_v55 = vld [vmem:[#allocation7 + $0x4] ss:$16 sps:$4 sm:$0xff]  }
  0x9a   : > { %706 = vmatprep.subr.bf16.mxu0 %v3047_v10  ;;  %778 = vmatpush1.bf16.msra.mxu1 %v3097_v31  ;;  %v3119_v56 = vld [vmem:[#allocation5 + $0x16c] ss:$16 sps:$4 sm:$0xff]   ;;  %v3804_v57 = vld [vmem:[%s3788_s12] ss:$8 sps:$4 sm:$0xff]   ;;  %v3148_v61 = vld [vmem:[#allocation7 + $0x24] ss:$16 sps:$4 sm:$0xff]  }
  0x9b   : > { %779 = vmatprep.subr.bf16.mxu1 %v3098_v32  ;;  %v3807_v58 = vld [vmem:[%s3788_s12 + $0x14] ss:$8 sps:$4 sm:$0xff]   ;;  %v3121_v59 = vld [vmem:[#allocation5 + $0x168] ss:$16 sps:$4 sm:$0xff]   ;;  %v3140_v60 = vld [vmem:[#allocation7] ss:$16 sps:$4 sm:$0xff]  }
  0x9c   : > { %v3125_v62 = vld [vmem:[#allocation5 + $0x18c] ss:$16 sps:$4 sm:$0xff]   ;;  %v3127_v63 = vld [vmem:[#allocation5 + $0x188] ss:$16 sps:$4 sm:$0xff]   ;;  %v3146_v0 = vld [vmem:[#allocation7 + $0x20] ss:$16 sps:$4 sm:$0xff]  }
  0x9d   : > { %707 = vmatpush1.bf16.msra.mxu0 %v3049_v11  ;;  %v3154_v1 = vld [vmem:[#allocation7 + $0x44] ss:$16 sps:$4 sm:$0xff]   ;;  %v3128_v2 = vld [vmem:[#allocation5 + $0x1ac] ss:$16 sps:$4 sm:$0xff]   ;;  %v3115_v3 = vld [vmem:[%s3788_s12 + $0x10] ss:$8 sps:$4 sm:$0xff]  }
  0x9e   : > { %708 = vmatprep.subr.bf16.mxu0 %v3050_v12  ;;  %780 = vmatpush1.bf16.msra.mxu1 %v3100_v35  ;;  %v3813_v4 = vld [vmem:[%s3788_s12 + $0x24] ss:$8 sps:$4 sm:$0xff]   ;;  %v3130_v5 = vld [vmem:[#allocation5 + $0x1a8] ss:$16 sps:$4 sm:$0xff]   ;;  %v3152_v6 = vld [vmem:[#allocation7 + $0x40] ss:$16 sps:$4 sm:$0xff]  }
  0x9f   : > { %781 = vmatprep.subr.bf16.mxu1 %v3101_v36  ;;  %v3160_v7 = vld [vmem:[#allocation7 + $0x64] ss:$16 sps:$4 sm:$0xff]   ;;  %v3134_v8 = vld [vmem:[#allocation5 + $0x1cc] ss:$16 sps:$4 sm:$0xff]   ;;  %v3136_v9 = vld [vmem:[#allocation5 + $0x1c8] ss:$16 sps:$4 sm:$0xff]  }
  0xa0   : > { %v3158_v10 = vld [vmem:[#allocation7 + $0x60] ss:$16 sps:$4 sm:$0xff]   ;;  %v3166_v11 = vld [vmem:[#allocation7 + $0x84] ss:$16 sps:$4 sm:$0xff]   ;;  %v3137_v12 = vld [vmem:[#allocation5 + $0x1ec] ss:$16 sps:$4 sm:$0xff]  }
  0xa1   : > { %709 = vmatpush1.bf16.msra.mxu0 %v3052_v14  ;;  %v3124_v13 = vld [vmem:[%s3788_s12 + $0x20] ss:$8 sps:$4 sm:$0xff]   ;;  %v3131_v14 = vld [vmem:[%s3788_s12 + $0x34] ss:$8 sps:$4 sm:$0xff]   ;;  %s2555_s21 = sshll.u32 %s3784_s14, 5  ;;  %s2811_s8 = sshll.u32 %s3613_s19, 9 }
  0xa2   : > { %710 = vmatprep.subr.bf16.mxu0 %v3053_v16  ;;  %782 = vmatpush1.bf16.msra.mxu1 %v3103_v39  ;;  %v3139_v15 = vld [vmem:[#allocation5 + $0x1e8] ss:$16 sps:$4 sm:$0xff]   ;;  %v3164_v16 = vld [vmem:[#allocation7 + $0x80] ss:$16 sps:$4 sm:$0xff]   ;;  %v3172_v17 = vld [vmem:[#allocation7 + $0xa4] ss:$16 sps:$4 sm:$0xff]   ;;  %s3867_s27 = scalar_lea.hbm %s3915_s4, %s2811_s8 }
  0xa3   : > { %783 = vmatprep.subr.bf16.mxu1 %v3104_v40  ;;  %v3145_v18 = vld [vmem:[#allocation7 + $0xc] ss:$16 sps:$4 sm:$0xff]   ;;  %v3143_v19 = vld [vmem:[#allocation7 + $0x8] ss:$16 sps:$4 sm:$0xff]   ;;  %v3170_v20 = vld [vmem:[#allocation7 + $0xa0] ss:$16 sps:$4 sm:$0xff]  }
  0xa4   : > { %v3176_v23 = vld [vmem:[#allocation7 + $0xc0] ss:$16 sps:$4 sm:$0xff]   ;;  %v3178_v24 = vld [vmem:[#allocation7 + $0xc4] ss:$16 sps:$4 sm:$0xff]   ;;  %v3157_v27 = vld [vmem:[#allocation7 + $0x4c] ss:$16 sps:$4 sm:$0xff]  }
  0xa5   : > { %711 = vmatpush1.bf16.msra.mxu0 %v3055_v21  ;;  %v3819_v21 = vld [vmem:[%s3788_s12 + $0x30] ss:$8 sps:$4 sm:$0xff]   ;;  %v3190_v31 = vld [vmem:[#allocation7 + $0x104] ss:$16 sps:$4 sm:$0xff]   ;;  %v3169_v35 = vld [vmem:[#allocation7 + $0x8c] ss:$16 sps:$4 sm:$0xff]  }
  0xa6   : > { %712 = vmatprep.subr.bf16.mxu0 %v3056_v22  ;;  %784 = vmatpush1.bf16.msra.mxu1 %v3106_v43  ;;  %v3151_v22 = vld [vmem:[#allocation7 + $0x2c] ss:$16 sps:$4 sm:$0xff]   ;;  %v3182_v28 = vld [vmem:[#allocation7 + $0xe0] ss:$16 sps:$4 sm:$0xff]   ;;  %v3202_v39 = vld [vmem:[#allocation7 + $0x144] ss:$16 sps:$4 sm:$0xff]  }
  0xa7   : > { %785 = vmatprep.subr.bf16.mxu1 %v3107_v44  ;;  %v3188_v32 = vld [vmem:[#allocation7 + $0x100] ss:$16 sps:$4 sm:$0xff]   ;;  %v3181_v43 = vld [vmem:[#allocation7 + $0xcc] ss:$16 sps:$4 sm:$0xff]   ;;  %s3855_s23 = scalar_lea.vmem [#allocation10], %s2555_s21  ;;  %s2425_s26 = scalar_lea.sflag [#allocation4], %s3784_s14 }
  0xa8   : > { %v3194_v36 = vld [vmem:[#allocation7 + $0x120] ss:$16 sps:$4 sm:$0xff]   ;;  %s2438_s6 = sshll.u32 %s3855_s23, 4  ;;  %s3564_s19 = smov [#allocation10]   ;;  %s3862_s6 = int_to_ptr.vmem [resolvable:$true] %s2438_s6 }
  0xa9   : > { %713 = vmatpush1.bf16.msra.mxu0 %v3058_v25  ;;  %v3149_v25 = vld [vmem:[#allocation7 + $0x28] ss:$16 sps:$4 sm:$0xff]   ;;  %v3200_v40 = vld [vmem:[#allocation7 + $0x140] ss:$16 sps:$4 sm:$0xff]   ;;  %s3478_s30 = scalar_lea.vmem %s3862_s6, 512  ;;  %s3482_s29 = sshll.u32 %s3564_s19, 4  ;;  %s3483_s29 = int_to_ptr.vmem [resolvable:$false] %s3482_s29 }
  0xaa   : > { %714 = vmatprep.subr.bf16.mxu0 %v3059_v26  ;;  %786 = vmatpush1.bf16.msra.mxu1 %v3109_v47  ;;  %v3184_v26 = vld [vmem:[#allocation7 + $0xe4] ss:$16 sps:$4 sm:$0xff]   ;;  %v3206_v44 = vld [vmem:[#allocation7 + $0x160] ss:$16 sps:$4 sm:$0xff]   ;;  %v3187_v47 = vld [vmem:[#allocation7 + $0xec] ss:$16 sps:$4 sm:$0xff]   ;;  %p3479_p0 = scmp.ne.s32.totalorder %s3862_s6, %s3478_s30  ;;  %p3485_p11 = scmp.lt.s32.totalorder %s3862_s6, %s3483_s29 }
  0xab   : > { %787 = vmatprep.subr.bf16.mxu1 %v3110_v48  ;;  %v3212_v48 = vld [vmem:[#allocation7 + $0x180] ss:$16 sps:$4 sm:$0xff]   ;;  %s3484_s5 = scalar_lea.vmem %s3483_s29, 1024 }
  0xac   : > { %p3480_p3 = pnand %p3479_p0, %p3736_p5  ;;  %p3486_p2 = scmp.lt.s32.totalorder %s3484_s5, %s3478_s30 }
  0xad   : > { %715 = vmatpush1.bf16.msra.mxu0 %v3061_v29  ;;  %v3155_v29 = vld [vmem:[#allocation7 + $0x48] ss:$16 sps:$4 sm:$0xff]  }
  0xae   : > { %716 = vmatprep.subr.bf16.mxu0 %v3062_v30  ;;  %788 = vmatpush1.bf16.msra.mxu1 %v3112_v51  ;;  %v3163_v30 = vld [vmem:[#allocation7 + $0x6c] ss:$16 sps:$4 sm:$0xff]   ;;  %p3481_p7 = pneg %p3480_p3  ;;  %p3487_p1 = por %p3486_p2, %p3485_p11 }
  0xaf   : > { %789 = vmatprep.subr.bf16.mxu1 %v3116_v52  ;;  %v3193_v51 = vld [vmem:[#allocation7 + $0x10c] ss:$16 sps:$4 sm:$0xff]   ;;  %v3218_v52 = vld [vmem:[#allocation7 + $0x1a0] ss:$16 sps:$4 sm:$0xff]  }
  0xb0   : > { %p3488_p4 = pnand %p3487_p1, %p3481_p7 }
  0xb1   : > { %717 = vmatpush1.bf16.msra.mxu0 %v3064_v33  ;;  %v3161_v33 = vld [vmem:[#allocation7 + $0x68] ss:$16 sps:$4 sm:$0xff]  }
  0xb2   : > { %718 = vmatprep.subr.bf16.mxu0 %v3065_v34  ;;  %790 = vmatpush1.bf16.msra.mxu1 %v3118_v54  ;;  %v3196_v34 = vld [vmem:[#allocation7 + $0x124] ss:$16 sps:$4 sm:$0xff]   ;;  %v3199_v54 = vld [vmem:[#allocation7 + $0x12c] ss:$16 sps:$4 sm:$0xff]  }
  0xb3   : > { %791 = vmatprep.subr.bf16.mxu1 %v3119_v56  ;;  %v3205_v56 = vld [vmem:[#allocation7 + $0x14c] ss:$16 sps:$4 sm:$0xff]  }
  0xb5   : > { %719 = vmatpush1.bf16.msra.mxu0 %v3067_v37  ;;  %v3167_v37 = vld [vmem:[#allocation7 + $0x88] ss:$16 sps:$4 sm:$0xff]  }
  0xb6   : > { %720 = vmatprep.subr.bf16.mxu0 %v3068_v38  ;;  %792 = vmatpush1.bf16.msra.mxu1 %v3121_v59  ;;  %v3175_v38 = vld [vmem:[#allocation7 + $0xac] ss:$16 sps:$4 sm:$0xff]   ;;  %v3209_v59 = vld [vmem:[#allocation7 + $0x168] ss:$16 sps:$4 sm:$0xff]  }
  0xb7   : > { %793 = vmatprep.subr.bf16.mxu1 %v3125_v62  ;;  %v3223_v62 = vld [vmem:[#allocation7 + $0x1ac] ss:$16 sps:$4 sm:$0xff]  }
  0xb9   : > { %721 = vmatpush1.bf16.msra.mxu0 %v3070_v41  ;;  %v3173_v41 = vld [vmem:[#allocation7 + $0xa8] ss:$16 sps:$4 sm:$0xff]  }
  0xba   : > { %722 = vmatprep.subr.bf16.mxu0 %v3071_v42  ;;  %794 = vmatpush1.bf16.msra.mxu1 %v3127_v63  ;;  %v3208_v42 = vld [vmem:[#allocation7 + $0x164] ss:$16 sps:$4 sm:$0xff]   ;;  %v3221_v63 = vld [vmem:[#allocation7 + $0x1a8] ss:$16 sps:$4 sm:$0xff]  }
  0xbb   : > { %795 = vmatprep.subr.bf16.mxu1 %v3128_v2  ;;  %v3224_v2 = vld [vmem:[#allocation7 + $0x1c0] ss:$16 sps:$4 sm:$0xff]  }
  0xbd   : > { %723 = vmatpush1.bf16.msra.mxu0 %v3073_v45  ;;  %v3179_v45 = vld [vmem:[#allocation7 + $0xc8] ss:$16 sps:$4 sm:$0xff]  }
  0xbe   : > { %724 = vmatprep.subr.bf16.mxu0 %v3074_v46  ;;  %796 = vmatpush1.bf16.msra.mxu1 %v3130_v5  ;;  %v3214_v46 = vld [vmem:[#allocation7 + $0x184] ss:$16 sps:$4 sm:$0xff]   ;;  %v3235_v5 = vld [vmem:[#allocation7 + $0x1ec] ss:$16 sps:$4 sm:$0xff]  }
  0xbf   : > { %797 = vmatprep.subr.bf16.mxu1 %v3134_v8  ;;  %v3238_v8 = vld [vmem:[#allocation7 + $0x204] ss:$16 sps:$4 sm:$0xff]  }
  0xc1   : > { %725 = vmatpush1.bf16.msra.mxu0 %v3076_v49  ;;  %v3185_v49 = vld [vmem:[#allocation7 + $0xe8] ss:$16 sps:$4 sm:$0xff]  }
  0xc2   : > { %726 = vmatprep.subr.bf16.mxu0 %v3077_v50  ;;  %798 = vmatpush1.bf16.msra.mxu1 %v3136_v9  ;;  %v3220_v50 = vld [vmem:[#allocation7 + $0x1a4] ss:$16 sps:$4 sm:$0xff]   ;;  %v3241_v9 = vld [vmem:[#allocation7 + $0x20c] ss:$16 sps:$4 sm:$0xff]  }
  0xc3   : > { %799 = vmatprep.subr.bf16.mxu1 %v3137_v12 }
  0xc5   : > { %727 = vmatpush1.bf16.msra.mxu0 %v3081_v53  ;;  %v3191_v53 = vld [vmem:[#allocation7 + $0x108] ss:$16 sps:$4 sm:$0xff]  }
  0xc6   : > { %1658 = vmatprep.subr.bf16.mxu0 %v3142_v55  ;;  %800 = vmatpush1.bf16.msra.mxu1 %v3139_v15  ;;  %v3197_v55 = vld [vmem:[#allocation7 + $0x128] ss:$16 sps:$4 sm:$0xff]  }
  0xc7   : > { %1804 = vmatprep.subr.bf16.mxu1 %v3145_v18 }
  0xc8   : > { %729 = vmatmul.mubr.bf16.vlgmr.msra.gmra.mrb[0].mxu0 %v3804_v57 }
  0xc9   : > { %738 = vmatprep.mubr.bf16.mxu0 %v3807_v58  ;;  %1659 = vmatpush1.bf16.msra.mxu0 %v3140_v60  ;;  %v3217_v60 = vld [vmem:[#allocation7 + $0x18c] ss:$16 sps:$4 sm:$0xff]  }
  0xca   : > { %1660 = vmatprep.subr.bf16.mxu0 %v3148_v61  ;;  %802 = vmatmul.mubr.bf16.vlgmr.msra.gmra.mrb[0].mxu1 %v3804_v57  ;;  %v3203_v57 = vld [vmem:[#allocation7 + $0x148] ss:$16 sps:$4 sm:$0xff]  }
  0xcb   : > { %811 = vmatprep.mubr.bf16.mxu1 %v3807_v58  ;;  %1805 = vmatpush1.bf16.msra.mxu1 %v3143_v19  ;;  %v3211_v58 = vld [vmem:[#allocation7 + $0x16c] ss:$16 sps:$4 sm:$0xff]   ;;  %v3215_v61 = vld [vmem:[#allocation7 + $0x188] ss:$16 sps:$4 sm:$0xff]  }
  0xcc   : > { %1806 = vmatprep.subr.bf16.mxu1 %v3151_v22  ;;  %v3244_v22 = vld [vmem:[#allocation7 + $0x224] ss:$16 sps:$4 sm:$0xff]  }
  0xcd   : > { %1661 = vmatpush1.bf16.msra.mxu0 %v3146_v0  ;;  %v3226_v0 = vld [vmem:[#allocation7 + $0x1c4] ss:$16 sps:$4 sm:$0xff]  }
  0xce   : > { %1662 = vmatprep.subr.bf16.mxu0 %v3154_v1  ;;  %v3229_v1 = vld [vmem:[#allocation7 + $0x1cc] ss:$16 sps:$4 sm:$0xff]  }
  0xcf   : > { %1807 = vmatpush1.bf16.msra.mxu1 %v3149_v25 }
  0xd0   : > { %739 = vmatmul.mubr.bf16.gmra.mrb[4].mxu0 %v3115_v3  ;;  %1808 = vmatprep.subr.bf16.mxu1 %v3157_v27  ;;  %v3242_v27 = vld [vmem:[#allocation7 + $0x220] ss:$16 sps:$4 sm:$0xff]  }
  0xd1   : > { %748 = vmatprep.mubr.bf16.mxu0 %v3813_v4  ;;  %1663 = vmatpush1.bf16.msra.mxu0 %v3152_v6  ;;  %v3230_v6 = vld [vmem:[#allocation7 + $0x1e0] ss:$16 sps:$4 sm:$0xff]  }
  0xd2   : > { %1664 = vmatprep.subr.bf16.mxu0 %v3160_v7  ;;  %812 = vmatmul.mubr.bf16.gmra.mrb[4].mxu1 %v3115_v3  ;;  %v3227_v3 = vld [vmem:[#allocation7 + $0x1c8] ss:$16 sps:$4 sm:$0xff]  }
  0xd3   : > { %821 = vmatprep.mubr.bf16.mxu1 %v3813_v4  ;;  %1809 = vmatpush1.bf16.msra.mxu1 %v3155_v29  ;;  %v3232_v4 = vld [vmem:[#allocation7 + $0x1e4] ss:$16 sps:$4 sm:$0xff]   ;;  %v3233_v7 = vld [vmem:[#allocation7 + $0x1e8] ss:$16 sps:$4 sm:$0xff]  }
  0xd4   : > { %1810 = vmatprep.subr.bf16.mxu1 %v3163_v30 }
  0xd5   : > { %1665 = vmatpush1.bf16.msra.mxu0 %v3158_v10 }
  0xd6   : > { %1666 = vmatprep.subr.bf16.mxu0 %v3166_v11 }
  0xd7   : > { %1811 = vmatpush1.bf16.msra.mxu1 %v3161_v33 }
  0xd8   : > { %749 = vmatmul.mubr.bf16.gmra.mrb[8].mxu0 %v3124_v13  ;;  %1812 = vmatprep.subr.bf16.mxu1 %v3169_v35 }
  0xd9   : > { %758 = vmatprep.mubr.bf16.mxu0 %v3131_v14  ;;  %1667 = vmatpush1.bf16.msra.mxu0 %v3164_v16 }
  0xda   : > { %1668 = vmatprep.subr.bf16.mxu0 %v3172_v17  ;;  %822 = vmatmul.mubr.bf16.gmra.mrb[8].mxu1 %v3124_v13 }
  0xdb   : > { %831 = vmatprep.mubr.bf16.mxu1 %v3131_v14  ;;  %1813 = vmatpush1.bf16.msra.mxu1 %v3167_v37  ;;  %v3248_v37 = vld [vmem:[#allocation7 + $0x240] ss:$16 sps:$4 sm:$0xff]  }
  0xdc   : > { %1814 = vmatprep.subr.bf16.mxu1 %v3175_v38  ;;  %v3251_v38 = vld [vmem:[#allocation7 + $0x248] ss:$16 sps:$4 sm:$0xff]  }
  0xdd   : > { %1669 = vmatpush1.bf16.msra.mxu0 %v3170_v20  ;;  %v3236_v20 = vld [vmem:[#allocation7 + $0x200] ss:$16 sps:$4 sm:$0xff]  }
  0xde   : > { %1670 = vmatprep.subr.bf16.mxu0 %v3178_v24 }
  0xdf   : > { %1815 = vmatpush1.bf16.msra.mxu1 %v3173_v41  ;;  %v3259_v41 = vld [vmem:[#allocation7 + $0x26c] ss:$16 sps:$4 sm:$0xff]  }
  0xe0   : > { %759 = vmatmul.mubr.bf16.gmra.mrb[12].mxu0 %v3819_v21  ;;  %1816 = vmatprep.subr.bf16.mxu1 %v3181_v43 }
  0xe1   : > { %1671 = vmatpush1.bf16.msra.mxu0 %v3176_v23  ;;  %v3247_v23 = vld [vmem:[#allocation7 + $0x22c] ss:$16 sps:$4 sm:$0xff]  }
  0xe2   : > { %1672 = vmatprep.subr.bf16.mxu0 %v3184_v26  ;;  %832 = vmatmul.mubr.bf16.gmra.mrb[12].mxu1 %v3819_v21  ;;  %v3239_v21 = vld [vmem:[#allocation7 + $0x208] ss:$16 sps:$4 sm:$0xff]  }
  0xe3   : > { %1817 = vmatpush1.bf16.msra.mxu1 %v3179_v45  ;;  %v3254_v45 = vld [vmem:[#allocation7 + $0x260] ss:$16 sps:$4 sm:$0xff]  }
  0xe4   : > { %1818 = vmatprep.subr.bf16.mxu1 %v3187_v47 }
  0xe5   : > { %1673 = vmatpush1.bf16.msra.mxu0 %v3182_v28  ;;  %v3245_v28 = vld [vmem:[#allocation7 + $0x228] ss:$16 sps:$4 sm:$0xff]  }
  0xe6   : > { %1674 = vmatprep.subr.bf16.mxu0 %v3190_v31  ;;  %v3250_v31 = vld [vmem:[#allocation7 + $0x244] ss:$16 sps:$4 sm:$0xff]  }
  0xe7   : > { %1819 = vmatpush1.bf16.msra.mxu1 %v3185_v49  ;;  %v3262_v49 = vld [vmem:[#allocation7 + $0x284] ss:$16 sps:$4 sm:$0xff]  }
  0xe8   : > { %1820 = vmatprep.subr.bf16.mxu1 %v3193_v51 }
  0xe9   : > { %1675 = vmatpush1.bf16.msra.mxu0 %v3188_v32  ;;  %v3253_v32 = vld [vmem:[#allocation7 + $0x24c] ss:$16 sps:$4 sm:$0xff]  }
  0xea   : > { %1676 = vmatprep.subr.bf16.mxu0 %v3196_v34 }
  0xeb   : > { %1821 = vmatpush1.bf16.msra.mxu1 %v3191_v53 }
  0xec   : > { %1822 = vmatprep.subr.bf16.mxu1 %v3199_v54 }
  0xed   : > { %1677 = vmatpush1.bf16.msra.mxu0 %v3194_v36 }
  0xee   : > { %1678 = vmatprep.subr.bf16.mxu0 %v3202_v39 }
  0xef   : > { %1823 = vmatpush1.bf16.msra.mxu1 %v3197_v55 }
  0xf0   : > { %1824 = vmatprep.subr.bf16.mxu1 %v3205_v56  ;;  %v3260_v56 = vld [vmem:[#allocation7 + $0x280] ss:$16 sps:$4 sm:$0xff]  }
  0xf1   : > { %1679 = vmatpush1.bf16.msra.mxu0 %v3200_v40  ;;  %v3256_v40 = vld [vmem:[#allocation7 + $0x264] ss:$16 sps:$4 sm:$0xff]  }
  0xf2   : > { %1680 = vmatprep.subr.bf16.mxu0 %v3208_v42 }
  0xf3   : > { %1825 = vmatpush1.bf16.msra.mxu1 %v3203_v57  ;;  %v3263_v57 = vld [vmem:[#allocation7 + $0x288] ss:$16 sps:$4 sm:$0xff]  }
  0xf4   : > { %1826 = vmatprep.subr.bf16.mxu1 %v3211_v58 }
  0xf5   : > { %1681 = vmatpush1.bf16.msra.mxu0 %v3206_v44 }
  0xf6   : > { %1682 = vmatprep.subr.bf16.mxu0 %v3214_v46  ;;  %v3257_v46 = vld [vmem:[#allocation7 + $0x268] ss:$16 sps:$4 sm:$0xff]  }
  0xf7   : > { %1827 = vmatpush1.bf16.msra.mxu1 %v3209_v59 }
  0xf8   : > { %1828 = vmatprep.subr.bf16.mxu1 %v3217_v60 }
  0xf9   : > { %1683 = vmatpush1.bf16.msra.mxu0 %v3212_v48 }
  0xfa   : > { %1684 = vmatprep.subr.bf16.mxu0 %v3220_v50  ;;  %v3265_v50 = vld [vmem:[#allocation7 + $0x28c] ss:$16 sps:$4 sm:$0xff]  }
  0xfb   : > { %1829 = vmatpush1.bf16.msra.mxu1 %v3215_v61  ;;  %v3268_v61 = vld [vmem:[#allocation7 + $0x2a4] ss:$16 sps:$4 sm:$0xff]  }
  0xfc   : > { %1830 = vmatprep.subr.bf16.mxu1 %v3223_v62  ;;  %v3271_v62 = vld [vmem:[#allocation7 + $0x2ac] ss:$16 sps:$4 sm:$0xff]  }
  0xfd   : > { %1685 = vmatpush1.bf16.msra.mxu0 %v3218_v52 }
  0xfe   : > { %1686 = vmatprep.subr.bf16.mxu0 %v3226_v0 }
  0xff   : > { %1831 = vmatpush1.bf16.msra.mxu1 %v3221_v63 }
 0x100   : > { %1832 = vmatprep.subr.bf16.mxu1 %v3229_v1 }
 0x101   : > { %1687 = vmatpush1.bf16.msra.mxu0 %v3224_v2 }
 0x102   : > { %1688 = vmatprep.subr.bf16.mxu0 %v3232_v4 }
 0x103   : > { %1833 = vmatpush1.bf16.msra.mxu1 %v3227_v3 }
 0x104   : > { %1834 = vmatprep.subr.bf16.mxu1 %v3235_v5 }
 0x105   : > { %1689 = vmatpush1.bf16.msra.mxu0 %v3230_v6 }
 0x106   : > { %1731 = vmatprep.subr.bf16.mxu0 %v3238_v8  ;;  %v3269_v8 = vld [vmem:[#allocation7 + $0x2a8] ss:$16 sps:$4 sm:$0xff]  }
 0x107   : > { %1835 = vmatpush1.bf16.msra.mxu1 %v3233_v7  ;;  %v3266_v7 = vld [vmem:[#allocation7 + $0x2a0] ss:$16 sps:$4 sm:$0xff]  }
 0x108   : > { %1877 = vmatprep.subr.bf16.mxu1 %v3241_v9 }
 0x19b   : > { %v730_v10 = vpop.f32.mrb[0].mxu0 }
 0x19c   : > { %v732_v11 = vpop.f32.mrb[1].mxu0  ;;  %v842_v13 = vmax.f32 %v730_v10, 0.0 }
 0x19d   : > { %v734_v12 = vpop.f32.mrb[2].mxu0  ;;  %v843_v16 = vmax.f32 %v732_v11, 0.0  ;;  %v803_v55 = vpop.f32.mrb[0].mxu1 }
 0x19e   : > { %v846_v14 = vmax.f32 %v734_v12, 0.0  ;;  %v736_v15 = vpop.f32.mrb[3].mxu0  ;;  %v844_v59 = vmax.f32 %v803_v55, 0.0  ;;  %v805_v60 = vpop.f32.mrb[1].mxu1  ;;  %v3274_v12 = vld [vmem:[#allocation7 + $0x2c4] ss:$16 sps:$4 sm:$0xff]  }
 0x19f   : > { %v847_v17 = vmax.f32 %v736_v15, 0.0  ;;  %v845_v63 = vmax.f32 %v805_v60, 0.0  ;;  %v807_v0 = vpop.f32.mrb[2].mxu1 }
 0x1a0   : > { %v874_v18 = vpack.c.bf16 %v846_v14, %v842_v13  ;;  %v848_v2 = vmax.f32 %v807_v0, 0.0  ;;  %v809_v3 = vpop.f32.mrb[3].mxu1  ;;  %v3277_v13 = vld [vmem:[#allocation7 + $0x2cc] ss:$16 sps:$4 sm:$0xff]  }
 0x1a1   : > { %v875_v19 = vpack.c.bf16 %v847_v17, %v843_v16  ;;  %v849_v6 = vmax.f32 %v809_v3, 0.0 }
 0x1a2   : > { %v3826_v11 = vpack.c.bf16 %v848_v2, %v844_v59 }
 0x1a3   : > { %1690 = vmatprep.mubr.bf16.mxu0 %v875_v19  ;;  %1836 = vmatprep.mubr.bf16.mxu1 %v875_v19  ;;  %v740_v24 = vpop.f32.mrb[4].mxu0  ;;  %v877_v16 = vpack.c.bf16 %v849_v6, %v845_v63 }
 0x1a4   : > { %1691 = vmatmul.mubr.bf16.vlgmr.msra.gmra.mrb[16].mxu0 %v874_v18  ;;  %1837 = vmatmul.mubr.bf16.vlgmr.msra.gmra.mrb[16].mxu1 %v874_v18  ;;  %v850_v25 = vmax.f32 %v740_v24, 0.0  ;;  %v742_v26 = vpop.f32.mrb[5].mxu0 }
 0x1a5   : > { %1732 = vmatpush1.bf16.msra.mxu0 %v3236_v20  ;;  %1878 = vmatpush1.bf16.msra.mxu1 %v3239_v21  ;;  %v851_v29 = vmax.f32 %v742_v26, 0.0  ;;  %v744_v30 = vpop.f32.mrb[6].mxu0  ;;  %v813_v19 = vpop.f32.mrb[4].mxu1  ;;  %v3272_v20 = vld [vmem:[#allocation7 + $0x2c0] ss:$16 sps:$4 sm:$0xff]  }
 0x1a6   : > { %1733 = vmatprep.subr.bf16.mxu0 %v3244_v22  ;;  %1879 = vmatprep.subr.bf16.mxu1 %v3247_v23  ;;  %v854_v33 = vmax.f32 %v744_v30, 0.0  ;;  %v746_v34 = vpop.f32.mrb[7].mxu0  ;;  %v3275_v21 = vld [vmem:[#allocation7 + $0x2c8] ss:$16 sps:$4 sm:$0xff]   ;;  %v852_v23 = vmax.f32 %v813_v19, 0.0  ;;  %v815_v24 = vpop.f32.mrb[5].mxu1 }
 0x1a7   : > { %v855_v35 = vmax.f32 %v746_v34, 0.0  ;;  %v3283_v26 = vld [vmem:[#allocation7 + $0x2ec] ss:$16 sps:$4 sm:$0xff]   ;;  %v3320_v19 = vld [vmem:[#allocation7 + $0x3c0] ss:$16 sps:$4 sm:$0xff]  }
 0x1a8   : > { %v878_v36 = vpack.c.bf16 %v854_v33, %v850_v25  ;;  %v3280_v25 = vld [vmem:[#allocation7 + $0x2e4] ss:$16 sps:$4 sm:$0xff]   ;;  %v3281_v33 = vld [vmem:[#allocation7 + $0x2e8] ss:$16 sps:$4 sm:$0xff]  }
 0x1a9   : > { %1734 = vmatpush1.bf16.msra.mxu0 %v3242_v27  ;;  %1880 = vmatpush1.bf16.msra.mxu1 %v3245_v28  ;;  %v879_v39 = vpack.c.bf16 %v855_v35, %v851_v29  ;;  %v853_v27 = vmax.f32 %v815_v24, 0.0  ;;  %v817_v28 = vpop.f32.mrb[6].mxu1  ;;  %v3286_v35 = vld [vmem:[#allocation7 + $0x304] ss:$16 sps:$4 sm:$0xff]   ;;  %v3329_v24 = vld [vmem:[#allocation7 + $0x3e8] ss:$16 sps:$4 sm:$0xff]  }
 0x1aa   : > { %1735 = vmatprep.subr.bf16.mxu0 %v3250_v31  ;;  %1881 = vmatprep.subr.bf16.mxu1 %v3253_v32  ;;  %v856_v29 = vmax.f32 %v817_v28, 0.0  ;;  %v819_v30 = vpop.f32.mrb[7].mxu1  ;;  %v3278_v32 = vld [vmem:[#allocation7 + $0x2e0] ss:$16 sps:$4 sm:$0xff]  }
 0x1ab   : > { %v750_v42 = vpop.f32.mrb[8].mxu0  ;;  %1700 = vmatprep.mubr.bf16.mxu0 %v879_v39  ;;  %1846 = vmatprep.mubr.bf16.mxu1 %v879_v39  ;;  %v857_v31 = vmax.f32 %v819_v30, 0.0  ;;  %v3284_v39 = vld [vmem:[#allocation7 + $0x300] ss:$16 sps:$4 sm:$0xff]   ;;  %v3337_v30 = vld [vmem:[#allocation8 + $0xc8] sm:$0xff]  }
 0x1ac   : > { %v858_v43 = vmax.f32 %v750_v42, 0.0  ;;  %v752_v44 = vpop.f32.mrb[9].mxu0  ;;  %1701 = vmatmul.mubr.bf16.gmra.mrb[20].mxu0 %v878_v36  ;;  %1847 = vmatmul.mubr.bf16.gmra.mrb[20].mxu1 %v878_v36  ;;  %v3828_v34 = vpack.c.bf16 %v856_v29, %v852_v23  ;;  %v3289_v36 = vld [vmem:[#allocation7 + $0x30c] ss:$16 sps:$4 sm:$0xff]   ;;  %v3326_v23 = vld [vmem:[#allocation7 + $0x3e0] ss:$16 sps:$4 sm:$0xff]  }
 0x1ad   : > { %1736 = vmatpush1.bf16.msra.mxu0 %v3248_v37  ;;  %1882 = vmatpush1.bf16.msra.mxu1 %v3251_v38  ;;  %v859_v47 = vmax.f32 %v752_v44, 0.0  ;;  %v754_v48 = vpop.f32.mrb[10].mxu0  ;;  %v3830_v37 = vpack.c.bf16 %v857_v31, %v853_v27  ;;  %v823_v38 = vpop.f32.mrb[8].mxu1  ;;  %v3295_v44 = vld [vmem:[#allocation7 + $0x32c] ss:$16 sps:$4 sm:$0xff]   ;;  %v3334_v27 = vld [vmem:[#allocation8] sm:$0xff]  }
 0x1ae   : > { %1737 = vmatprep.subr.bf16.mxu0 %v3256_v40  ;;  %1883 = vmatprep.subr.bf16.mxu1 %v3259_v41  ;;  %v862_v51 = vmax.f32 %v754_v48, 0.0  ;;  %v756_v52 = vpop.f32.mrb[11].mxu0  ;;  %v3287_v40 = vld [vmem:[#allocation7 + $0x308] ss:$16 sps:$4 sm:$0xff]   ;;  %v860_v41 = vmax.f32 %v823_v38, 0.0  ;;  %v825_v42 = vpop.f32.mrb[9].mxu1 }
 0x1af   : > { %v863_v53 = vmax.f32 %v756_v52, 0.0  ;;  %v3335_v28 = vld [vmem:[#allocation8 + $0x80] sm:$0xff]   ;;  %v3336_v29 = vld [vmem:[#allocation8 + $0x48] sm:$0xff]   ;;  %v3343_v38 = vld [vmem:[#allocation8 + $0x90] sm:$0xff]  }
 0x1b0   : > { %v882_v54 = vpack.c.bf16 %v862_v51, %v858_v43  ;;  %v3292_v43 = vld [vmem:[#allocation7 + $0x324] ss:$16 sps:$4 sm:$0xff]   ;;  %v3293_v51 = vld [vmem:[#allocation7 + $0x328] ss:$16 sps:$4 sm:$0xff]  }
 0x1b1   : > { %1738 = vmatpush1.bf16.msra.mxu0 %v3254_v45  ;;  %1884 = vmatpush1.bf16.msra.mxu1 %v3257_v46  ;;  %v883_v58 = vpack.c.bf16 %v863_v53, %v859_v47  ;;  %v861_v45 = vmax.f32 %v825_v42, 0.0  ;;  %v827_v46 = vpop.f32.mrb[10].mxu1  ;;  %v3298_v53 = vld [vmem:[#allocation7 + $0x344] ss:$16 sps:$4 sm:$0xff]   ;;  %v3338_v31 = vld [vmem:[#allocation8 + $0x8] sm:$0xff]  }
 0x1b2   : > { %1739 = vmatprep.subr.bf16.mxu0 %v3262_v49  ;;  %1885 = vmatprep.subr.bf16.mxu1 %v3265_v50  ;;  %v864_v47 = vmax.f32 %v827_v46, 0.0  ;;  %v829_v48 = vpop.f32.mrb[11].mxu1  ;;  %v3290_v50 = vld [vmem:[#allocation7 + $0x320] ss:$16 sps:$4 sm:$0xff]   ;;  %v3354_v46 = vld [vmem:[#allocation8 + $0x28] sm:$0xff]  }
 0x1b3   : > { %v760_v1 = vpop.f32.mrb[12].mxu0  ;;  %1710 = vmatprep.mubr.bf16.mxu0 %v883_v58  ;;  %1856 = vmatprep.mubr.bf16.mxu1 %v883_v58  ;;  %v865_v49 = vmax.f32 %v829_v48, 0.0  ;;  %v3299_v58 = vld [vmem:[#allocation7 + $0x348] ss:$16 sps:$4 sm:$0xff]   ;;  %v3349_v42 = vld [vmem:[#allocation8 + $0xe0] sm:$0xff]   ;;  %v3356_v48 = vld [vmem:[#allocation8 + $0x70] sm:$0xff]  }
 0x1b4   : > { %v866_v4 = vmax.f32 %v760_v1, 0.0  ;;  %v762_v5 = vpop.f32.mrb[13].mxu0  ;;  %1711 = vmatmul.mubr.bf16.gmra.mrb[24].mxu0 %v882_v54  ;;  %1857 = vmatmul.mubr.bf16.gmra.mrb[24].mxu1 %v882_v54  ;;  %v3832_v52 = vpack.c.bf16 %v864_v47, %v860_v41  ;;  %v3301_v54 = vld [vmem:[#allocation7 + $0x34c] ss:$16 sps:$4 sm:$0xff]   ;;  %v3348_v41 = vld [vmem:[#allocation8 + $0x60] sm:$0xff]  }
 0x1b5   : > { %1740 = vmatpush1.bf16.msra.mxu0 %v3260_v56  ;;  %1886 = vmatpush1.bf16.msra.mxu1 %v3263_v57  ;;  %v867_v9 = vmax.f32 %v762_v5, 0.0  ;;  %v764_v10 = vpop.f32.mrb[14].mxu0  ;;  %v3834_v55 = vpack.c.bf16 %v865_v49, %v861_v45  ;;  %v833_v56 = vpop.f32.mrb[12].mxu1  ;;  %v3296_v57 = vld [vmem:[#allocation7 + $0x340] ss:$16 sps:$4 sm:$0xff]   ;;  %v3352_v45 = vld [vmem:[#allocation8 + $0x68] sm:$0xff]  }
 0x1b6   : > { %1741 = vmatprep.subr.bf16.mxu0 %v3268_v61  ;;  %1887 = vmatprep.subr.bf16.mxu1 %v3271_v62  ;;  %v870_v14 = vmax.f32 %v764_v10, 0.0  ;;  %v766_v15 = vpop.f32.mrb[15].mxu0  ;;  %v868_v59 = vmax.f32 %v833_v56, 0.0  ;;  %v835_v60 = vpop.f32.mrb[13].mxu1  ;;  %v3304_v61 = vld [vmem:[#allocation7 + $0x364] ss:$16 sps:$4 sm:$0xff]  }
 0x1b7   : > { %v871_v17 = vmax.f32 %v766_v15, 0.0  ;;  %v3307_v62 = vld [vmem:[#allocation7 + $0x36c] ss:$16 sps:$4 sm:$0xff]   ;;  %v869_v63 = vmax.f32 %v835_v60, 0.0  ;;  %v837_v0 = vpop.f32.mrb[14].mxu1  ;;  %v3357_v49 = vld [vmem:[#allocation8 + $0xf0] sm:$0xff]  }
 0x1b8   : > { %v886_v18 = vpack.c.bf16 %v870_v14, %v866_v4  ;;  %v872_v1 = vmax.f32 %v837_v0, 0.0  ;;  %v839_v2 = vpop.f32.mrb[15].mxu1  ;;  %v3302_v4 = vld [vmem:[#allocation7 + $0x360] ss:$16 sps:$4 sm:$0xff]   ;;  %v3305_v5 = vld [vmem:[#allocation7 + $0x368] ss:$16 sps:$4 sm:$0xff]  }
 0x1b9   : > { %1742 = vmatpush1.bf16.msra.mxu0 %v3266_v7  ;;  %1888 = vmatpush1.bf16.msra.mxu1 %v3269_v8  ;;  %v887_v22 = vpack.c.bf16 %v871_v17, %v867_v9  ;;  %v873_v3 = vmax.f32 %v839_v2, 0.0  ;;  %v3310_v7 = vld [vmem:[#allocation7 + $0x384] ss:$16 sps:$4 sm:$0xff]   ;;  %v3313_v8 = vld [vmem:[#allocation7 + $0x38c] ss:$16 sps:$4 sm:$0xff]  }
 0x1ba   : > { %1743 = vmatprep.subr.bf16.mxu0 %v3274_v12  ;;  %1889 = vmatprep.subr.bf16.mxu1 %v3277_v13  ;;  %v3836_v6 = vpack.c.bf16 %v872_v1, %v868_v59  ;;  %v3308_v10 = vld [vmem:[#allocation7 + $0x380] ss:$16 sps:$4 sm:$0xff]   ;;  %v3311_v12 = vld [vmem:[#allocation7 + $0x388] ss:$16 sps:$4 sm:$0xff]   ;;  %v3316_v13 = vld [vmem:[#allocation7 + $0x3a4] ss:$16 sps:$4 sm:$0xff]  }
 0x1bb   : > { %1720 = vmatprep.mubr.bf16.mxu0 %v887_v22  ;;  %1866 = vmatprep.mubr.bf16.mxu1 %v887_v22  ;;  %v3838_v9 = vpack.c.bf16 %v873_v3, %v869_v63  ;;  %v3319_v14 = vld [vmem:[#allocation7 + $0x3ac] ss:$16 sps:$4 sm:$0xff]   ;;  %v3314_v15 = vld [vmem:[#allocation7 + $0x3a0] ss:$16 sps:$4 sm:$0xff]   ;;  %v3322_v17 = vld [vmem:[#allocation7 + $0x3c4] ss:$16 sps:$4 sm:$0xff]  }
 0x1bc   : > { %1721 = vmatmul.mubr.bf16.gmra.mrb[28].mxu0 %v886_v18  ;;  %1867 = vmatmul.mubr.bf16.gmra.mrb[28].mxu1 %v886_v18  ;;  %v3325_v18 = vld [vmem:[#allocation7 + $0x3cc] ss:$16 sps:$4 sm:$0xff]  }
 0x1bd   : > { %1744 = vmatpush1.bf16.msra.mxu0 %v3272_v20  ;;  %1890 = vmatpush1.bf16.msra.mxu1 %v3275_v21  ;;  %v3323_v20 = vld [vmem:[#allocation7 + $0x3c8] ss:$16 sps:$4 sm:$0xff]   ;;  %v3328_v21 = vld [vmem:[#allocation7 + $0x3e4] ss:$16 sps:$4 sm:$0xff]   ;;  %v3331_v22 = vld [vmem:[#allocation7 + $0x3ec] ss:$16 sps:$4 sm:$0xff]  }
 0x1be   : > { %1745 = vmatprep.subr.bf16.mxu0 %v3280_v25  ;;  %1891 = vmatprep.subr.bf16.mxu1 %v3283_v26  ;;  %v3332_v25 = vld [vmem:[#allocation8 + $0x40] sm:$0xff]   ;;  %v3355_v47 = vld [vmem:[#allocation8 + $0xa8] sm:$0xff]  }
 0x1bf   : > { %1763 = vmatprep.mubr.bf16.mxu0 %v877_v16  ;;  %1909 = vmatprep.mubr.bf16.mxu1 %v877_v16  ;;  %v3317_v16 = vld [vmem:[#allocation7 + $0x3a8] ss:$16 sps:$4 sm:$0xff]   ;;  %v3333_v26 = vld [vmem:[#allocation8 + $0xc0] sm:$0xff]  }
 0x1c1   : > { %1746 = vmatpush1.bf16.msra.mxu0 %v3278_v32  ;;  %1892 = vmatpush1.bf16.msra.mxu1 %v3281_v33  ;;  %v3339_v32 = vld [vmem:[#allocation8 + $0x88] sm:$0xff]   ;;  %v3340_v33 = vld [vmem:[#allocation8 + $0x50] sm:$0xff]  }
 0x1c2   : > { %1747 = vmatprep.subr.bf16.mxu0 %v3286_v35  ;;  %1893 = vmatprep.subr.bf16.mxu1 %v3289_v36  ;;  %v3341_v35 = vld [vmem:[#allocation8 + $0xd0] sm:$0xff]  }
 0x1c3   : > { %v3342_v36 = vld [vmem:[#allocation8 + $0x10] sm:$0xff]  }
 0x1c5   : > { %1748 = vmatpush1.bf16.msra.mxu0 %v3284_v39  ;;  %1894 = vmatpush1.bf16.msra.mxu1 %v3287_v40  ;;  %v3344_v39 = vld [vmem:[#allocation8 + $0x58] sm:$0xff]  }
 0x1c6   : > { %1749 = vmatprep.subr.bf16.mxu0 %v3292_v43  ;;  %1895 = vmatprep.subr.bf16.mxu1 %v3295_v44  ;;  %v3347_v40 = vld [vmem:[#allocation8 + $0x98] sm:$0xff]   ;;  %v3350_v43 = vld [vmem:[#allocation8 + $0x20] sm:$0xff]  }
 0x1c7   : > { %v3351_v44 = vld [vmem:[#allocation8 + $0xa0] sm:$0xff]  }
 0x1c9   : > { %1750 = vmatpush1.bf16.msra.mxu0 %v3290_v50  ;;  %1896 = vmatpush1.bf16.msra.mxu1 %v3293_v51  ;;  %v3358_v50 = vld [vmem:[#allocation8 + $0x30] sm:$0xff]  }
 0x1ca   : > { %1751 = vmatprep.subr.bf16.mxu0 %v3298_v53  ;;  %1897 = vmatprep.subr.bf16.mxu1 %v3301_v54  ;;  %v3359_v51 = vld [vmem:[#allocation8 + $0xb0] sm:$0xff]   ;;  %v3361_v53 = vld [vmem:[#allocation8 + $0xf8] sm:$0xff]  }
 0x1cb   : > { %v3362_v54 = vld [vmem:[#allocation8 + $0x38] sm:$0xff]  }
 0x1cd   : > { %1752 = vmatpush1.bf16.msra.mxu0 %v3296_v57  ;;  %1898 = vmatpush1.bf16.msra.mxu1 %v3299_v58 }
 0x1ce   : > { %1753 = vmatprep.subr.bf16.mxu0 %v3304_v61  ;;  %1899 = vmatprep.subr.bf16.mxu1 %v3307_v62 }
 0x1d1   : > { %1754 = vmatpush1.bf16.msra.mxu0 %v3302_v4  ;;  %1900 = vmatpush1.bf16.msra.mxu1 %v3305_v5 }
 0x1d2   : > { %1755 = vmatprep.subr.bf16.mxu0 %v3310_v7  ;;  %1901 = vmatprep.subr.bf16.mxu1 %v3313_v8 }
 0x1d5   : > { %1756 = vmatpush1.bf16.msra.mxu0 %v3308_v10  ;;  %1902 = vmatpush1.bf16.msra.mxu1 %v3311_v12 }
 0x1d6   : > { %1757 = vmatprep.subr.bf16.mxu0 %v3316_v13  ;;  %1903 = vmatprep.subr.bf16.mxu1 %v3319_v14 }
 0x1d9   : > { %1758 = vmatpush1.bf16.msra.mxu0 %v3314_v15  ;;  %1904 = vmatpush1.bf16.msra.mxu1 %v3317_v16 }
 0x1da   : > { %1759 = vmatprep.subr.bf16.mxu0 %v3322_v17  ;;  %1905 = vmatprep.subr.bf16.mxu1 %v3325_v18 }
 0x1dd   : > { %1760 = vmatpush1.bf16.msra.mxu0 %v3320_v19  ;;  %1906 = vmatpush1.bf16.msra.mxu1 %v3323_v20 }
 0x1de   : > { %1761 = vmatprep.subr.bf16.mxu0 %v3328_v21  ;;  %1907 = vmatprep.subr.bf16.mxu1 %v3331_v22 }
 0x1e1   : > { %1762 = vmatpush1.bf16.msra.mxu0 %v3326_v23  ;;  %1908 = vmatpush1.bf16.msra.mxu1 %v3329_v24 }
 0x1e2   : > { %2835 = vmatprep.subr.bf16.mxu0 %v3332_v25  ;;  %2875 = vmatprep.subr.bf16.mxu1 %v3333_v26 }
 0x1e4   : > { %1764 = vmatmul.mubr.bf16.vlgmr.msra.gmra.mrb[16].mxu0 %v3826_v11  ;;  %1910 = vmatmul.mubr.bf16.vlgmr.msra.gmra.mrb[16].mxu1 %v3826_v11  ;;  %v3345_v11 = vld [vmem:[#allocation8 + $0xd8] sm:$0xff]  }
 0x1e5   : > { %1773 = vmatprep.mubr.bf16.mxu0 %v3830_v37  ;;  %1919 = vmatprep.mubr.bf16.mxu1 %v3830_v37  ;;  %v3346_v37 = vld [vmem:[#allocation8 + $0x18] sm:$0xff]  }
 0x1e6   : > { %2836 = vmatpush3.bf16.msra.mxu0 %v3334_v27  ;;  %2876 = vmatpush3.bf16.msra.mxu1 %v3335_v28 }
 0x1e7   : > { %2837 = vmatprep.subr.bf16.mxu0 %v3336_v29  ;;  %2877 = vmatprep.subr.bf16.mxu1 %v3337_v30 }
 0x1ea   : > { %2838 = vmatpush3.bf16.msra.mxu0 %v3338_v31  ;;  %2878 = vmatpush3.bf16.msra.mxu1 %v3339_v32 }
 0x1eb   : > { %2839 = vmatprep.subr.bf16.mxu0 %v3340_v33  ;;  %2879 = vmatprep.subr.bf16.mxu1 %v3341_v35 }
 0x1ec   : > { %1774 = vmatmul.mubr.bf16.gmra.mrb[20].mxu0 %v3828_v34  ;;  %1920 = vmatmul.mubr.bf16.gmra.mrb[20].mxu1 %v3828_v34  ;;  %v3353_v34 = vld [vmem:[#allocation8 + $0xe8] sm:$0xff]  }
 0x1ed   : > { %1783 = vmatprep.mubr.bf16.mxu0 %v3834_v55  ;;  %1929 = vmatprep.mubr.bf16.mxu1 %v3834_v55  ;;  %v3363_v55 = vld [vmem:[#allocation8 + $0xb8] sm:$0xff]  }
 0x1ee   : > { %2840 = vmatpush3.bf16.msra.mxu0 %v3342_v36  ;;  %2880 = vmatpush3.bf16.msra.mxu1 %v3343_v38 }
 0x1ef   : > { %2841 = vmatprep.subr.bf16.mxu0 %v3344_v39  ;;  %2881 = vmatprep.subr.bf16.mxu1 %v3345_v11 }
 0x1f2   : > { %2842 = vmatpush3.bf16.msra.mxu0 %v3346_v37  ;;  %2882 = vmatpush3.bf16.msra.mxu1 %v3347_v40 }
 0x1f3   : > { %2843 = vmatprep.subr.bf16.mxu0 %v3348_v41  ;;  %2883 = vmatprep.subr.bf16.mxu1 %v3349_v42 }
 0x1f4   : > { %1784 = vmatmul.mubr.bf16.gmra.mrb[24].mxu0 %v3832_v52  ;;  %1930 = vmatmul.mubr.bf16.gmra.mrb[24].mxu1 %v3832_v52  ;;  %v3360_v52 = vld [vmem:[#allocation8 + $0x78] sm:$0xff]  }
 0x1f5   : > { %1793 = vmatprep.mubr.bf16.mxu0 %v3838_v9  ;;  %1939 = vmatprep.mubr.bf16.mxu1 %v3838_v9 }
 0x1f6   : > { %2844 = vmatpush3.bf16.msra.mxu0 %v3350_v43  ;;  %2884 = vmatpush3.bf16.msra.mxu1 %v3351_v44 }
 0x1f7   : > { %2845 = vmatprep.subr.bf16.mxu0 %v3352_v45  ;;  %2885 = vmatprep.subr.bf16.mxu1 %v3353_v34 }
 0x1fa   : > { %2846 = vmatpush3.bf16.msra.mxu0 %v3354_v46  ;;  %2886 = vmatpush3.bf16.msra.mxu1 %v3355_v47 }
 0x1fb   : > { %2847 = vmatprep.subr.bf16.mxu0 %v3356_v48  ;;  %2887 = vmatprep.subr.bf16.mxu1 %v3357_v49 }
 0x1fc   : > { %1794 = vmatmul.mubr.bf16.gmra.mrb[28].mxu0 %v3836_v6  ;;  %1940 = vmatmul.mubr.bf16.gmra.mrb[28].mxu1 %v3836_v6 }
 0x1fe   : > { %2848 = vmatpush3.bf16.msra.mxu0 %v3358_v50  ;;  %2888 = vmatpush3.bf16.msra.mxu1 %v3359_v51 }
 0x1ff   : > { %2849 = vmatprep.subr.bf16.mxu0 %v3360_v52  ;;  %2889 = vmatprep.subr.bf16.mxu1 %v3361_v53 }
 0x202   : > { %2850 = vmatpush3.bf16.msra.mxu0 %v3362_v54  ;;  %2890 = vmatpush3.bf16.msra.mxu1 %v3363_v55 }
 0x2b7   : > { %v1765_v56 = vpop.f32.mrb[16].mxu0  ;;  %v1911_v57 = vpop.f32.mrb[16].mxu1 }
 0x2b8   : > { %v1767_v58 = vpop.f32.mrb[17].mxu0  ;;  %v1913_v59 = vpop.f32.mrb[17].mxu1  ;;  %v1950_v62 = vmax.f32 %v1765_v56, 0.0  ;;  %v1952_v63 = vmax.f32 %v1911_v57, 0.0 }
 0x2b9   : > { %v1769_v60 = vpop.f32.mrb[18].mxu0  ;;  %v1915_v61 = vpop.f32.mrb[18].mxu1  ;;  %v1951_v4 = vmax.f32 %v1767_v58, 0.0  ;;  %v1953_v5 = vmax.f32 %v1913_v59, 0.0 }
 0x2ba   : > { %v1954_v0 = vmax.f32 %v1769_v60, 0.0  ;;  %v1956_v1 = vmax.f32 %v1915_v61, 0.0  ;;  %v1771_v2 = vpop.f32.mrb[19].mxu0  ;;  %v1917_v3 = vpop.f32.mrb[19].mxu1 }
 0x2bb   : > { %v1955_v6 = vmax.f32 %v1771_v2, 0.0  ;;  %v1957_v7 = vmax.f32 %v1917_v3, 0.0 }
 0x2bc   : > { %v1982_v8 = vpack.c.bf16 %v1954_v0, %v1950_v62  ;;  %v1984_v9 = vpack.c.bf16 %v1956_v1, %v1952_v63 }
 0x2bd   : > { %v1983_v10 = vpack.c.bf16 %v1955_v6, %v1951_v4  ;;  %v1985_v12 = vpack.c.bf16 %v1957_v7, %v1953_v5 }
 0x2bf   : > { %v1775_v13 = vpop.f32.mrb[20].mxu0  ;;  %v1921_v14 = vpop.f32.mrb[20].mxu1  ;;  %2286 = vmatprep.mubr.bf16.mxu0 %v1983_v10  ;;  %2351 = vmatprep.mubr.bf16.mxu1 %v1985_v12 }
 0x2c0   : > { %v1777_v15 = vpop.f32.mrb[21].mxu0  ;;  %v1923_v16 = vpop.f32.mrb[21].mxu1  ;;  %2287 = vmatmul.mubr.bf16.vlgmr.msra.gmra.mrb[32].mxu0 %v1982_v8  ;;  %2352 = vmatmul.mubr.bf16.vlgmr.msra.gmra.mrb[32].mxu1 %v1984_v9  ;;  %v1958_v19 = vmax.f32 %v1775_v13, 0.0  ;;  %v1960_v20 = vmax.f32 %v1921_v14, 0.0 }
 0x2c1   : > { %v1779_v17 = vpop.f32.mrb[22].mxu0  ;;  %v1925_v18 = vpop.f32.mrb[22].mxu1  ;;  %v1959_v25 = vmax.f32 %v1777_v15, 0.0  ;;  %v1961_v26 = vmax.f32 %v1923_v16, 0.0 }
 0x2c2   : > { %v1962_v21 = vmax.f32 %v1779_v17, 0.0  ;;  %v1964_v22 = vmax.f32 %v1925_v18, 0.0  ;;  %v1781_v23 = vpop.f32.mrb[23].mxu0  ;;  %v1927_v24 = vpop.f32.mrb[23].mxu1 }
 0x2c3   : > { %v1963_v27 = vmax.f32 %v1781_v23, 0.0  ;;  %v1965_v28 = vmax.f32 %v1927_v24, 0.0 }
 0x2c4   : > { %v1986_v29 = vpack.c.bf16 %v1962_v21, %v1958_v19  ;;  %v1988_v30 = vpack.c.bf16 %v1964_v22, %v1960_v20 }
 0x2c5   : > { %v1987_v31 = vpack.c.bf16 %v1963_v27, %v1959_v25  ;;  %v1989_v32 = vpack.c.bf16 %v1965_v28, %v1961_v26 }
 0x2c7   : > { %v1785_v33 = vpop.f32.mrb[24].mxu0  ;;  %v1931_v35 = vpop.f32.mrb[24].mxu1  ;;  %2294 = vmatprep.mubr.bf16.mxu0 %v1987_v31  ;;  %2359 = vmatprep.mubr.bf16.mxu1 %v1989_v32 }
 0x2c8   : > { %v1787_v36 = vpop.f32.mrb[25].mxu0  ;;  %v1933_v38 = vpop.f32.mrb[25].mxu1  ;;  %2295 = vmatmul.mubr.bf16.gmra.mrb[36].mxu0 %v1986_v29  ;;  %2360 = vmatmul.mubr.bf16.gmra.mrb[36].mxu1 %v1988_v30  ;;  %v1966_v37 = vmax.f32 %v1785_v33, 0.0  ;;  %v1968_v40 = vmax.f32 %v1931_v35, 0.0 }
 0x2c9   : > { %v1789_v39 = vpop.f32.mrb[26].mxu0  ;;  %v1935_v11 = vpop.f32.mrb[26].mxu1  ;;  %v1967_v45 = vmax.f32 %v1787_v36, 0.0  ;;  %v1969_v34 = vmax.f32 %v1933_v38, 0.0 }
 0x2ca   : > { %v1970_v41 = vmax.f32 %v1789_v39, 0.0  ;;  %v1972_v42 = vmax.f32 %v1935_v11, 0.0  ;;  %v1791_v43 = vpop.f32.mrb[27].mxu0  ;;  %v1937_v44 = vpop.f32.mrb[27].mxu1 }
 0x2cb   : > { %v1971_v46 = vmax.f32 %v1791_v43, 0.0  ;;  %v1973_v47 = vmax.f32 %v1937_v44, 0.0 }
 0x2cc   : > { %v1990_v48 = vpack.c.bf16 %v1970_v41, %v1966_v37  ;;  %v1992_v49 = vpack.c.bf16 %v1972_v42, %v1968_v40 }
 0x2cd   : > { %v1991_v50 = vpack.c.bf16 %v1971_v46, %v1967_v45  ;;  %v1993_v51 = vpack.c.bf16 %v1973_v47, %v1969_v34 }
 0x2cf   : > { %v1795_v52 = vpop.f32.mrb[28].mxu0  ;;  %v1941_v53 = vpop.f32.mrb[28].mxu1  ;;  %2302 = vmatprep.mubr.bf16.mxu0 %v1991_v50  ;;  %2367 = vmatprep.mubr.bf16.mxu1 %v1993_v51 }
 0x2d0   : > { %v1797_v54 = vpop.f32.mrb[29].mxu0  ;;  %v1943_v55 = vpop.f32.mrb[29].mxu1  ;;  %2303 = vmatmul.mubr.bf16.gmra.mrb[40].mxu0 %v1990_v48  ;;  %2368 = vmatmul.mubr.bf16.gmra.mrb[40].mxu1 %v1992_v49  ;;  %v1974_v58 = vmax.f32 %v1795_v52, 0.0  ;;  %v1976_v59 = vmax.f32 %v1941_v53, 0.0 }
 0x2d1   : > { %v1799_v56 = vpop.f32.mrb[30].mxu0  ;;  %v1945_v57 = vpop.f32.mrb[30].mxu1  ;;  %v1975_v0 = vmax.f32 %v1797_v54, 0.0  ;;  %v1977_v1 = vmax.f32 %v1943_v55, 0.0 }
 0x2d2   : > { %v1978_v60 = vmax.f32 %v1799_v56, 0.0  ;;  %v1980_v61 = vmax.f32 %v1945_v57, 0.0  ;;  %v1801_v62 = vpop.f32.mrb[31].mxu0  ;;  %v1947_v63 = vpop.f32.mrb[31].mxu1 }
 0x2d3   : > { %v1979_v2 = vmax.f32 %v1801_v62, 0.0  ;;  %v1981_v3 = vmax.f32 %v1947_v63, 0.0 }
 0x2d4   : > { %v1994_v4 = vpack.c.bf16 %v1978_v60, %v1974_v58  ;;  %v1996_v5 = vpack.c.bf16 %v1980_v61, %v1976_v59 }
 0x2d5   : > { %v1995_v6 = vpack.c.bf16 %v1979_v2, %v1975_v0  ;;  %v1997_v7 = vpack.c.bf16 %v1981_v3, %v1977_v1 }
 0x2d7   : > { %2310 = vmatprep.mubr.bf16.mxu0 %v1995_v6  ;;  %2375 = vmatprep.mubr.bf16.mxu1 %v1997_v7 }
 0x2d8   : > { %2311 = vmatmul.mubr.bf16.gmra.mrb[44].mxu0 %v1994_v4  ;;  %2376 = vmatmul.mubr.bf16.gmra.mrb[44].mxu1 %v1996_v5 }
 0x393   : > { %v2851_v8 = vpop.f32.mrb[32].mxu0  ;;  %v2891_v9 = vpop.f32.mrb[32].mxu1 }
 0x394   : > { %v2852_v10 = vpop.f32.mrb[33].mxu0  ;;  %v2892_v12 = vpop.f32.mrb[33].mxu1 }
 0x395   : > { %v2853_v13 = vadd.f32 %v2852_v10, %v2851_v8  ;;  %v2893_v14 = vadd.f32 %v2892_v12, %v2891_v9  ;;  %v2854_v15 = vpop.f32.mrb[34].mxu0  ;;  %v2894_v16 = vpop.f32.mrb[34].mxu1 }
 0x396   : > { %v2855_v17 = vpop.f32.mrb[35].mxu0  ;;  %v2895_v18 = vpop.f32.mrb[35].mxu1 }
 0x397   : > { %v2354_v19 = vadd.f32 %v2893_v14, %v2853_v13  ;;  %v2856_v20 = vadd.f32 %v2855_v17, %v2854_v15  ;;  %v2896_v21 = vadd.f32 %v2895_v18, %v2894_v16 }
 0x399   : > { %v2357_v22 = vadd.f32 %v2896_v21, %v2856_v20 }
 0x39b   : > { %v2815_v23 = vpack.c.bf16 %v2357_v22, %v2354_v19  ;;  %v2857_v24 = vpop.f32.mrb[36].mxu0  ;;  %v2897_v25 = vpop.f32.mrb[36].mxu1 }
 0x39c   : > { %v2858_v26 = vpop.f32.mrb[37].mxu0  ;;  %v2898_v27 = vpop.f32.mrb[37].mxu1 }
 0x39d   : > { %2816 = vst [vmem:[%s3855_s23] sm:$0xff] %v2815_v23   ;;  %v2859_v28 = vadd.f32 %v2858_v26, %v2857_v24  ;;  %v2899_v29 = vadd.f32 %v2898_v27, %v2897_v25  ;;  %v2860_v30 = vpop.f32.mrb[38].mxu0  ;;  %v2900_v31 = vpop.f32.mrb[38].mxu1 }
 0x39e   : > { %v2861_v32 = vpop.f32.mrb[39].mxu0  ;;  %v2901_v33 = vpop.f32.mrb[39].mxu1 }
 0x39f   : > { %v2362_v35 = vadd.f32 %v2899_v29, %v2859_v28  ;;  %v2862_v36 = vadd.f32 %v2861_v32, %v2860_v30  ;;  %v2902_v38 = vadd.f32 %v2901_v33, %v2900_v31 }
 0x3a1   : > { %v2365_v39 = vadd.f32 %v2902_v38, %v2862_v36 }
 0x3a3   : > { %v2820_v11 = vpack.c.bf16 %v2365_v39, %v2362_v35  ;;  %v2863_v37 = vpop.f32.mrb[40].mxu0  ;;  %v2903_v40 = vpop.f32.mrb[40].mxu1 }
 0x3a4   : > { %v2864_v41 = vpop.f32.mrb[41].mxu0  ;;  %v2904_v42 = vpop.f32.mrb[41].mxu1 }
 0x3a5   : > { %2832 = vst [vmem:[%s3855_s23 + $0x8] sm:$0xff] %v2820_v11   ;;  %v2865_v43 = vadd.f32 %v2864_v41, %v2863_v37  ;;  %v2905_v44 = vadd.f32 %v2904_v42, %v2903_v40  ;;  %v2866_v45 = vpop.f32.mrb[42].mxu0  ;;  %v2906_v34 = vpop.f32.mrb[42].mxu1 }
 0x3a6   : > { %v2867_v46 = vpop.f32.mrb[43].mxu0  ;;  %v2907_v47 = vpop.f32.mrb[43].mxu1 }
 0x3a7   : > { %v2370_v48 = vadd.f32 %v2905_v44, %v2865_v43  ;;  %v2868_v49 = vadd.f32 %v2867_v46, %v2866_v45  ;;  %v2908_v50 = vadd.f32 %v2907_v47, %v2906_v34 }
 0x3a9   : > { %v2373_v51 = vadd.f32 %v2908_v50, %v2868_v49 }
 0x3ab   : > { %v2825_v52 = vpack.c.bf16 %v2373_v51, %v2370_v48  ;;  %v2869_v53 = vpop.f32.mrb[44].mxu0  ;;  %v2909_v54 = vpop.f32.mrb[44].mxu1 }
 0x3ac   : > { %v2870_v55 = vpop.f32.mrb[45].mxu0  ;;  %v2910_v56 = vpop.f32.mrb[45].mxu1 }
 0x3ad   : > { %2833 = vst [vmem:[%s3855_s23 + $0x10] sm:$0xff] %v2825_v52   ;;  %v2871_v57 = vadd.f32 %v2870_v55, %v2869_v53  ;;  %v2911_v58 = vadd.f32 %v2910_v56, %v2909_v54  ;;  %v2872_v59 = vpop.f32.mrb[46].mxu0  ;;  %v2912_v60 = vpop.f32.mrb[46].mxu1 }
 0x3ae   : > { %v2873_v61 = vpop.f32.mrb[47].mxu0  ;;  %v2913_v62 = vpop.f32.mrb[47].mxu1 }
 0x3af   : > { %v2378_v63 = vadd.f32 %v2911_v58, %v2871_v57  ;;  %v2874_v0 = vadd.f32 %v2873_v61, %v2872_v59  ;;  %v2914_v1 = vadd.f32 %v2913_v62, %v2912_v60 }
 0x3b1   : > { %v2381_v2 = vadd.f32 %v2914_v1, %v2874_v0 }
 0x3b3   : > { %v2830_v3 = vpack.c.bf16 %v2381_v2, %v2378_v63 }
 0x3b5   : > { %2834 = vst [vmem:[%s3855_s23 + $0x18] sm:$0xff] %v2830_v3  }
 0x3b6   : > { %3491 = shalt.err (!%p3488_p4)
}
 0x3b7   : > { %s3492_s7 = scalar_lea.hbm %s3867_s27, 512  ;;  %s3496_s25 = scalar_lea.hbm %s3915_s4, 2048 }
 0x3b8   : > { %p3493_p9 = scmp.ne.s32.totalorder %s3867_s27, %s3492_s7  ;;  %p3497_p8 = scmp.lt.u32.totalorder %s3867_s27, %s3915_s4 }
 0x3b9   : > { %p3498_p12 = scmp.lt.u32.totalorder %s3496_s25, %s3492_s7  ;;  %p3500_p0 = scmp.lt.u32.totalorder %s3492_s7, %s3867_s27 }
 0x3ba   : > { %p3494_p13 = pnand %p3493_p9, %p3736_p5 }
 0x3bb   : > { %p3499_p6 = por %p3498_p12, %p3497_p8 }
 0x3bc   : > { %p3495_p10 = pneg %p3494_p13 }
 0x3bd   : > { %p3501_p3 = por %p3500_p0, %p3499_p6 }
 0x3bf   : > { %p3502_p7 = pnand %p3501_p3, %p3495_p10 }
 0x3c1   : > { %3505 = shalt.err (!%p3502_p7)
}
 0x3c2   : > { %s3565_s23 = smov 64   ;;  %s3566_s8 = smov 4  }
 0x3c3   : > { %2961 = dma.vmem_to_hbm [thread:$0]  (%p3736_p5), %s3862_s6, 512, %s3867_s27, %s2425_s26, %s3565_s23, %s3565_s23, %s3566_s8  }
 0x3c4 PF: > { %p2988_p11 = scmp.ge.s32.totalorder %s3552_s18, 2  ;;  %s2453_s9 = sand.u32 1, %s3540_s15  }
 0x3c5   : > { %p3933_p2 = scmp.ne.s32.totalorder %s3920_s22, 0  ;;  %s2454_s28 = scalar_lea.sflag [#allocation4], %s2453_s9 }
 0x3c7   : > { %p2978_p1 = pnand %p2988_p11, %p3933_p2 }
 0x3c9   : > { %3535 = dma.done.wait (!%p2978_p1), %s2454_s28, 512  }
 0x3ca   : > { %3537 = vsyncadd (!%p2978_p1), %s2454_s28, 4294966784  ;;  %p19_p4 = scmp.ge.s32.totalorder %s3722_s11, 6   ;;  %s3934_s15 = smov %s3544_s16 }
 0x3cb   : > { %s3935_s16 = smov %s3548_s17  ;;  %s3936_s17 = smov %s3732_s13 }
 0x3cc   : > { %s3937_s18 = smov %s3722_s11  ;;  %21 = sbr.rel (!%p19_p4) target bundleno = 7 (0x7), region = 93 }
 0x3d3   :  { %2459 = vsyncpa [#allocation3], 1 }
 0x3d4   :  { %2461 = vsyncpa [#allocation3 + $0x1], 1 }
 0x3d5   :  { %2462 = vsyncpa [#allocation6], 1 }
 0x3d6   :  { %2463 = vsyncpa [#allocation9], 1 }
 0x3d7   :  { %2464 = vsyncpa [#allocation4], 1 }
 0x3d8   :  { %2466 = vsyncpa [#allocation4 + $0x1], 1 }

</bundles_post_ra>
